<compile_context>
chip_gen: v6e
topology: v6e:2x2x1
jax: 0.10.0
libtpu: 0.0.40
codegen_flags: <defaults>
</compile_context>

<pallas_src>
import functools

import numpy as np
import jax
import jax.numpy as jnp
from jax import lax
from jax.experimental import pallas as pl
from jax.experimental.pallas import tpu as pltpu

EPS = 1e-15
OUT_LANES = 128          # lane-dense packed output width


# ---------------------------------------------------------------------------
# small in-kernel helpers (pure f32)
# ---------------------------------------------------------------------------
def _dot(a, b):
    return jnp.dot(a, b, preferred_element_type=jnp.float32)


def _softmax_rows(z):
    m = jnp.max(z, axis=-1, keepdims=True)
    e = jnp.exp(z - m)
    return e / jnp.sum(e, axis=-1, keepdims=True)


def _fsum(x):
    # full sum of a 2-D array -> (1, 1)
    return jnp.sum(jnp.sum(x, axis=-1, keepdims=True), axis=-2, keepdims=True)


def _eye_bool(k):
    return (lax.broadcasted_iota(jnp.int32, (k, k), 0)
            == lax.broadcasted_iota(jnp.int32, (k, k), 1))


# ---------------------------------------------------------------------------
# host-side weight packing: one 8-row-aligned, 128-lane slab
# ---------------------------------------------------------------------------
_W_ORDER = [
    ("lin1_w", 2), ("lin1_b", 1),
    ("pool1_w", 2), ("pool1_b", 1),
    ("conv1_wrel", 2), ("conv1_wroot", 2), ("conv1_brel", 1),
    ("pool2_w", 2), ("pool2_b", 1),
    ("conv2_wrel", 2), ("conv2_wroot", 2), ("conv2_brel", 1),
    ("lin2_w", 2), ("lin2_b", 1),
    ("lin3_w", 2), ("lin3_b", 1),
]


def pack_weights(params):
    offs = {}
    pieces = []
    row = 0
    for name, rank in _W_ORDER:
        arr = params[name]
        if rank == 1:
            arr = arr.reshape(1, -1)
        r, c = arr.shape
        assert c <= OUT_LANES, name
        offs[name] = (row, r, c)
        rp = ((r + 7) // 8) * 8                     # sublane-aligned block
        block = jnp.zeros((rp, OUT_LANES), jnp.float32).at[:r, :c].set(
            arr.astype(jnp.float32))
        pieces.append(block)
        row += rp
    return jnp.concatenate(pieces, axis=0), offs


# ---------------------------------------------------------------------------
# fused kernel: Bg graphs per grid step, one lane-dense (Bg, 128) output row
# ---------------------------------------------------------------------------
def _ctnet_kernel(adj_ref, x_ref, mask_ref, w_ref, out_ref, *, offs, eps):
    bg, n, _ = adj_ref.shape
    fin = x_ref.shape[-1]

    def w(name):
        r0, r, c = offs[name]
        return w_ref[r0:r0 + r, 0:c]

    w_lin1, b_lin1 = w("lin1_w"), w("lin1_b")
    w_p1, b_p1 = w("pool1_w"), w("pool1_b")
    w_rel1, w_root1, b_rel1 = w("conv1_wrel"), w("conv1_wroot"), w("conv1_brel")
    w_p2, b_p2 = w("pool2_w"), w("pool2_b")
    w_rel2, w_root2, b_rel2 = w("conv2_wrel"), w("conv2_wroot"), w("conv2_brel")
    w_lin2, b_lin2 = w("lin2_w"), w("lin2_b")
    w_lin3, b_lin3 = w("lin3_w"), w("lin3_b")

    k1 = w_p1.shape[1]
    k2 = w_p2.shape[1]
    out_ch = w_lin3.shape[1]

    # flatten (Bg, N, .) -> (Bg*N, .): node-wise layers run in one MXU pass each
    x_flat = x_ref[...].reshape(bg * n, fin)
    mask_flat = mask_ref[...].reshape(bg * n, 1)

    # ---- lin1 + pool1 (all graphs' nodes together) --------------------------
    x = _dot(x_flat, w_lin1) + b_lin1                          # (Bg*N, H)
    s1 = _softmax_rows(_dot(x, w_p1) + b_p1) * mask_flat       # (Bg*N, K1)

    eye1b = _eye_bool(k1)
    eye2b = _eye_bool(k2)
    eye1 = eye1b.astype(jnp.float32)
    eye2 = eye2b.astype(jnp.float32)
    inv_sqrt_k1 = 1.0 / float(k1) ** 0.5
    inv_sqrt_k2 = 1.0 / float(k2) ** 0.5

    # ---- per-graph CT rewiring + neighbourhood aggregation ------------------
    agg_list, adj_r_list, ct_list, o1_list = [], [], [], []
    for g in range(bg):
        sl = slice(g * n, (g + 1) * n)
        x_g, s1_g, adj_g = x[sl], s1[sl], adj_ref[g]           # (N,H) (N,K1) (N,N)
        s1t = jnp.transpose(s1_g)                              # (K1, N), reused 4x
        deg = jnp.sum(adj_g, axis=-1, keepdims=True)           # (N, 1)

        ss1 = _dot(s1t, s1_g)                                  # S^T S
        stas1 = _dot(s1t, _dot(adj_g, s1_g))                   # S^T A S
        stds1 = _dot(s1t, s1_g * deg)                          # S^T D S

        tr_a = _fsum(stas1 * eye1)
        tr_d = _fsum(stds1 * eye1)
        ct_list.append((tr_d - tr_a) / (tr_d + eps))           # (1,1)
        ssn = jnp.sqrt(_fsum(ss1 * ss1))
        diff = ss1 / ssn - eye1 * inv_sqrt_k1
        o1_list.append(jnp.sqrt(_fsum(diff * diff)))           # (1,1)

        # CT-style rewired adjacency (pairwise distances on original topology,
        # symmetric sqrt-degree normalized)
        sq = jnp.sum(s1_g * s1_g, axis=-1, keepdims=True)      # (N,1)
        gram = _dot(s1_g, s1t)                                 # (N,N) -- reuses s1t
        dist = jnp.sqrt(jnp.maximum(sq + jnp.transpose(sq) - 2.0 * gram, 0.0))
        adj_new = dist * adj_g
        inv = lax.rsqrt(jnp.sum(adj_new, axis=-1, keepdims=True) + eps)
        adj_r = adj_new * inv * jnp.transpose(inv)             # (N,N)
        adj_r_list.append(adj_r)
        agg_list.append(_dot(adj_r, x_g))                      # (N,H)

    agg = jnp.concatenate(agg_list, axis=0)                    # (Bg*N, H)

    # ---- conv1 + pool2 (flat, no VMEM round-trip) ----------------------------
    xc = _dot(agg, w_rel1) + b_rel1 + _dot(x, w_root1)         # (Bg*N, H)
    s2 = _softmax_rows(_dot(xc, w_p2) + b_p2) * mask_flat      # (Bg*N, K2)

    # ---- per-graph dense mincut pooling + coarse aggregation ----------------
    xp_list, agg2_list, scal_list = [], [], []
    for g in range(bg):
        sl = slice(g * n, (g + 1) * n)
        xc_g, s2_g, m_g = xc[sl], s2[sl], mask_flat[sl]
        adj_r = adj_r_list[g]
        s2t = jnp.transpose(s2_g)                              # (K2, N), reused 4x

        x_p = _dot(s2t, xc_g * m_g)                            # (K2, H)
        stas2 = _dot(s2t, _dot(adj_r, s2_g))                   # (K2, K2)
        ss2 = _dot(s2t, s2_g)
        degr = jnp.sum(adj_r, axis=-1, keepdims=True)
        stds2 = _dot(s2t, s2_g * degr)

        num = _fsum(stas2 * eye2)
        den = _fsum(stds2 * eye2)
        mc = -(num / (den + eps))                              # (1,1)
        ssn2 = jnp.sqrt(_fsum(ss2 * ss2))
        diff2 = ss2 / ssn2 - eye2 * inv_sqrt_k2
        o2 = jnp.sqrt(_fsum(diff2 * diff2))                    # (1,1)
        scal_list.append(jnp.concatenate(
            [ct_list[g], o1_list[g], mc, o2], axis=-1))        # (1,4)

        # coarsened adjacency fix-up: zero diag + symmetric normalization
        out_adj = jnp.where(eye2b, 0.0, stas2)
        invd = lax.rsqrt(jnp.sum(out_adj, axis=-1, keepdims=True) + eps)
        out_adj = out_adj * invd * jnp.transpose(invd)         # (K2, K2)

        xp_list.append(x_p)
        agg2_list.append(_dot(out_adj, x_p))                   # (K2, H)

    x_p_all = jnp.concatenate(xp_list, axis=0)                 # (Bg*K2, H)
    agg2_all = jnp.concatenate(agg2_list, axis=0)

    # ---- conv2 (flat) + per-graph node sum + MLP head ------------------------
    x2 = _dot(agg2_all, w_rel2) + b_rel2 + _dot(x_p_all, w_root2)   # (Bg*K2, H)
    h = jnp.concatenate(
        [jnp.sum(x2[g * k2:(g + 1) * k2, :], axis=0, keepdims=True)
         for g in range(bg)], axis=0)                          # (Bg, H)
    h = jnp.maximum(_dot(h, w_lin2) + b_lin2, 0.0)
    y = _dot(h, w_lin3) + b_lin3                               # (Bg, out)
    y = y - jnp.max(y, axis=-1, keepdims=True)
    logp = y - jnp.log(jnp.sum(jnp.exp(y), axis=-1, keepdims=True))

    # ---- single lane-dense (Bg, 128) writeback -------------------------------
    scal = jnp.concatenate(scal_list, axis=0)                  # (Bg, 4)
    tail = OUT_LANES - out_ch - 4
    parts = [logp, scal]
    if tail:
        parts.append(jnp.zeros((bg, tail), jnp.float32))
    out_ref[0] = jnp.concatenate(parts, axis=-1)


def ctnet_fused(adj, x_d, mask3, w_slab, offs, eps, graphs_per_block=8):
    bsz, n, fin = x_d.shape
    out_ch = offs["lin3_w"][2]
    assert out_ch + 4 <= OUT_LANES

    bg = min(bsz, graphs_per_block)                 # tiny B: whole batch, 1 step
    nb = -(-bsz // bg)
    bpad = nb * bg
    if bpad != bsz:
        p = bpad - bsz
        adj = jnp.pad(adj, ((0, p), (0, 0), (0, 0)))
        x_d = jnp.pad(x_d, ((0, p), (0, 0), (0, 0)))
        mask3 = jnp.pad(mask3, ((0, p), (0, 0), (0, 0)))

    kernel = functools.partial(_ctnet_kernel, offs=offs, eps=eps)
    out = pl.pallas_call(
        kernel,
        grid=(nb,),
        out_shape=jax.ShapeDtypeStruct((nb, bg, OUT_LANES), jnp.float32),
        in_specs=[
            pl.BlockSpec((bg, n, n), lambda b: (b, 0, 0)),
            pl.BlockSpec((bg, n, fin), lambda b: (b, 0, 0)),
            pl.BlockSpec((bg, n, 1), lambda b: (b, 0, 0)),
            pl.BlockSpec(w_slab.shape, lambda b: (0, 0)),      # resident weights
        ],
        out_specs=pl.BlockSpec((1, bg, OUT_LANES), lambda b: (b, 0, 0)),
        compiler_params=pltpu.CompilerParams(
            dimension_semantics=("parallel",),      # megacore-shard the batch blocks
            vmem_limit_bytes=32 * 1024 * 1024,      # within v7x 64 MiB physical
        ),
    )(adj, x_d, mask3, w_slab)
    return out.reshape(bpad, OUT_LANES)[:bsz]


# ---------------------------------------------------------------------------
# JAX glue: to_dense_batch / to_dense_adj, parameter init, forward
# ---------------------------------------------------------------------------
def to_dense(x, edge_index, batch, num_graphs, max_nodes):
    n_total, f = x.shape
    counts = jnp.zeros((num_graphs,), jnp.int32).at[batch].add(1)
    starts = jnp.concatenate([jnp.zeros((1,), jnp.int32), jnp.cumsum(counts)[:-1]])
    pos = jnp.arange(n_total, dtype=jnp.int32) - starts[batch]
    x_d = jnp.zeros((num_graphs, max_nodes, f), jnp.float32).at[batch, pos].set(x)
    mask = jnp.zeros((num_graphs, max_nodes), jnp.float32).at[batch, pos].set(1.0)
    row, col = edge_index[0], edge_index[1]
    adj = jnp.zeros((num_graphs, max_nodes, max_nodes), jnp.float32).at[
        batch[row], pos[row], pos[col]].add(1.0)
    return x_d, adj, mask


def ctnet_forward(params, x_nodes, edge_index, batch, num_graphs, max_nodes, eps=EPS):
    x_d, adj, mask = to_dense(x_nodes, edge_index, batch, num_graphs, max_nodes)
    w_slab, offs = pack_weights(params)
    out_ch = params["lin3_w"].shape[1]

    res = ctnet_fused(adj, x_d, mask[..., None], w_slab, offs, eps)

    logp = res[:, :out_ch]
    ct_loss = jnp.mean(res[:, out_ch]) + jnp.mean(res[:, out_ch + 1])
    mincut_loss = jnp.mean(res[:, out_ch + 2]) + jnp.mean(res[:, out_ch + 3])
    return logp, ct_loss, mincut_loss


def _init_linear(key, fan_in, fan_out, bias=True):
    kw, kb = jax.random.split(key)
    bound = 1.0 / (fan_in ** 0.5)
    w = jax.random.uniform(kw, (fan_in, fan_out), jnp.float32, -bound, bound)
    b = jax.random.uniform(kb, (fan_out,), jnp.float32, -bound, bound) if bias else None
    return w, b


def init_params(key, in_channels, out_channels, k_centers, hidden=32):
    keys = jax.random.split(key, 9)
    p = {}
    p["lin1_w"], p["lin1_b"] = _init_linear(keys[0], in_channels, hidden)
    p["pool1_w"], p["pool1_b"] = _init_linear(keys[1], hidden, k_centers)
    p["pool2_w"], p["pool2_b"] = _init_linear(keys[2], hidden, 16)
    p["conv1_wrel"], p["conv1_brel"] = _init_linear(keys[3], hidden, hidden)
    p["conv1_wroot"], _ = _init_linear(keys[4], hidden, hidden, bias=False)
    p["conv2_wrel"], p["conv2_brel"] = _init_linear(keys[5], hidden, hidden)
    p["conv2_wroot"], _ = _init_linear(keys[6], hidden, hidden, bias=False)
    p["lin2_w"], p["lin2_b"] = _init_linear(keys[7], hidden, hidden)
    p["lin3_w"], p["lin3_b"] = _init_linear(keys[8], hidden, out_channels)
    return p


if __name__ == "__main__":
    in_channels, out_channels, k_centers, hidden = 4, 6, 8, 32
    num_graphs, max_nodes = 2, 16

    # graph 0: 12-node ring, graph 1: 16-node ring (undirected -> both directions)
    def ring(n, off):
        s = np.arange(n)
        d = (s + 1) % n
        return np.stack([np.concatenate([s, d]) + off, np.concatenate([d, s]) + off])

    edge_index = jnp.asarray(np.concatenate([ring(12, 0), ring(16, 12)], axis=1), jnp.int32)
    batch = jnp.asarray(np.array([0] * 12 + [1] * 16), jnp.int32)

    key = jax.random.PRNGKey(0)
    kx, kp = jax.random.split(key)
    x_nodes = jax.random.normal(kx, (28, in_channels), jnp.float32)
    params = init_params(kp, in_channels, out_channels, k_centers, hidden)

    fwd = jax.jit(functools.partial(ctnet_forward, num_graphs=num_graphs, max_nodes=max_nodes))
    logp, ct_loss, mincut_loss = fwd(params, x_nodes, edge_index, batch)
    jax.block_until_ready((logp, ct_loss, mincut_loss))

    assert logp.shape == (num_graphs, out_channels)
    assert bool(jnp.all(jnp.isfinite(logp)))
    assert bool(jnp.isfinite(ct_loss)) and bool(jnp.isfinite(mincut_loss))
    print("KERNEL_OK")
</pallas_src>

<mosaic_0001>
module attributes {stable_mosaic.version = 11 : i64} {
  func.func private @main(%arg0: i32) attributes {dimension_semantics = [#tpu.dimension_semantics<core_parallel>], iteration_bounds = array<i64: 2>, tpu.core_type = #tpu.core_type<sc_scalar_subcore>, window_params = []} {
    return
  }
}

module attributes {stable_mosaic.version = 11 : i64} {
  func.func private @main(%arg0: i32) attributes {dimension_semantics = [#tpu.dimension_semantics<core_parallel>], iteration_bounds = array<i64: 2>, tpu.core_type = #tpu.core_type<sc_scalar_subcore>, window_params = []} {
    return
  }
}

module attributes {stable_mosaic.version = 11 : i64} {
  func.func @_ctnet_kernel(%arg0: i32, %arg1: memref<2x16x16xf32, #tpu.memory_space<vmem>>, %arg2: memref<2x16x4xf32, #tpu.memory_space<vmem>>, %arg3: memref<2x16x1xf32, #tpu.memory_space<vmem>>, %arg4: memref<320x128xf32, #tpu.memory_space<vmem>>, %arg5: memref<1x2x128xf32, #tpu.memory_space<vmem>>) attributes {dimension_semantics = [#tpu.dimension_semantics<parallel>], iteration_bounds = array<i64: 1>, scalar_prefetch = 0 : i64, scratch_operands = 0 : i64, tpu.core_type = #tpu.core_type<tc>, window_params = [{transform_indices = @transform_0, window_bounds = array<i64: 2, 16, 16>}, {transform_indices = @transform_1, window_bounds = array<i64: 2, 16, 4>}, {transform_indices = @transform_2, window_bounds = array<i64: 2, 16, 1>}, {pipeline_mode = #tpu.pipeline_mode<synchronous>, transform_indices = @transform_3, window_bounds = array<i64: 320, 128>}, {transform_indices = @transform_4, window_bounds = array<i64: 1, 2, 128>}]} {
    %c0 = arith.constant 0 : index
    %c0_0 = arith.constant 0 : index
    %0 = vector.load %arg4[%c0, %c0_0] : memref<320x128xf32, #tpu.memory_space<vmem>>, vector<4x32xf32>
    %c8 = arith.constant 8 : index
    %c0_1 = arith.constant 0 : index
    %1 = vector.load %arg4[%c8, %c0_1] : memref<320x128xf32, #tpu.memory_space<vmem>>, vector<1x32xf32>
    %c16 = arith.constant 16 : index
    %c0_2 = arith.constant 0 : index
    %2 = vector.load %arg4[%c16, %c0_2] : memref<320x128xf32, #tpu.memory_space<vmem>>, vector<32x8xf32>
    %c48 = arith.constant 48 : index
    %c0_3 = arith.constant 0 : index
    %3 = vector.load %arg4[%c48, %c0_3] : memref<320x128xf32, #tpu.memory_space<vmem>>, vector<1x8xf32>
    %c56 = arith.constant 56 : index
    %c0_4 = arith.constant 0 : index
    %4 = vector.load %arg4[%c56, %c0_4] : memref<320x128xf32, #tpu.memory_space<vmem>>, vector<32x32xf32>
    %c88 = arith.constant 88 : index
    %c0_5 = arith.constant 0 : index
    %5 = vector.load %arg4[%c88, %c0_5] : memref<320x128xf32, #tpu.memory_space<vmem>>, vector<32x32xf32>
    %c120 = arith.constant 120 : index
    %c0_6 = arith.constant 0 : index
    %6 = vector.load %arg4[%c120, %c0_6] : memref<320x128xf32, #tpu.memory_space<vmem>>, vector<1x32xf32>
    %c128 = arith.constant 128 : index
    %c0_7 = arith.constant 0 : index
    %7 = vector.load %arg4[%c128, %c0_7] : memref<320x128xf32, #tpu.memory_space<vmem>>, vector<32x16xf32>
    %c160 = arith.constant 160 : index
    %c0_8 = arith.constant 0 : index
    %8 = vector.load %arg4[%c160, %c0_8] : memref<320x128xf32, #tpu.memory_space<vmem>>, vector<1x16xf32>
    %c168 = arith.constant 168 : index
    %c0_9 = arith.constant 0 : index
    %9 = vector.load %arg4[%c168, %c0_9] : memref<320x128xf32, #tpu.memory_space<vmem>>, vector<32x32xf32>
    %c200 = arith.constant 200 : index
    %c0_10 = arith.constant 0 : index
    %10 = vector.load %arg4[%c200, %c0_10] : memref<320x128xf32, #tpu.memory_space<vmem>>, vector<32x32xf32>
    %c232 = arith.constant 232 : index
    %c0_11 = arith.constant 0 : index
    %11 = vector.load %arg4[%c232, %c0_11] : memref<320x128xf32, #tpu.memory_space<vmem>>, vector<1x32xf32>
    %c240 = arith.constant 240 : index
    %c0_12 = arith.constant 0 : index
    %12 = vector.load %arg4[%c240, %c0_12] : memref<320x128xf32, #tpu.memory_space<vmem>>, vector<32x32xf32>
    %c272 = arith.constant 272 : index
    %c0_13 = arith.constant 0 : index
    %13 = vector.load %arg4[%c272, %c0_13] : memref<320x128xf32, #tpu.memory_space<vmem>>, vector<1x32xf32>
    %c280 = arith.constant 280 : index
    %c0_14 = arith.constant 0 : index
    %14 = vector.load %arg4[%c280, %c0_14] : memref<320x128xf32, #tpu.memory_space<vmem>>, vector<32x6xf32>
    %c312 = arith.constant 312 : index
    %c0_15 = arith.constant 0 : index
    %15 = vector.load %arg4[%c312, %c0_15] : memref<320x128xf32, #tpu.memory_space<vmem>>, vector<1x6xf32>
    %c0_16 = arith.constant 0 : index
    %c0_17 = arith.constant 0 : index
    %c0_18 = arith.constant 0 : index
    %16 = vector.load %arg2[%c0_16, %c0_17, %c0_18] : memref<2x16x4xf32, #tpu.memory_space<vmem>>, vector<2x16x4xf32>
    %17 = vector.shape_cast %16 : vector<2x16x4xf32> to vector<32x4xf32>
    %c0_19 = arith.constant 0 : index
    %c0_20 = arith.constant 0 : index
    %c0_21 = arith.constant 0 : index
    %18 = vector.load %arg3[%c0_19, %c0_20, %c0_21] : memref<2x16x1xf32, #tpu.memory_space<vmem>>, vector<2x16x1xf32>
    %19 = vector.shape_cast %18 : vector<2x16x1xf32> to vector<32x1xf32>
    %cst = arith.constant dense<0.000000e+00> : vector<32x32xf32>
    %20 = tpu.matmul %17, %0, %cst {dimension_numbers = #tpu.dot_dimension_numbers<[1], [0], [0], [1], [0, 0, 1, 1], [], []>} : vector<32x4xf32>, vector<4x32xf32>, vector<32x32xf32> -> vector<32x32xf32>
    %21 = vector.broadcast %1 : vector<1x32xf32> to vector<32x32xf32>
    %22 = arith.addf %20, %21 : vector<32x32xf32>
    %cst_22 = arith.constant dense<0.000000e+00> : vector<32x8xf32>
    %23 = tpu.matmul %22, %2, %cst_22 {dimension_numbers = #tpu.dot_dimension_numbers<[1], [0], [0], [1], [0, 0, 1, 1], [], []>} : vector<32x32xf32>, vector<32x8xf32>, vector<32x8xf32> -> vector<32x8xf32>
    %24 = vector.broadcast %3 : vector<1x8xf32> to vector<32x8xf32>
    %25 = arith.addf %23, %24 : vector<32x8xf32>
    %cst_23 = arith.constant dense<0xFF800000> : vector<32xf32>
    %26 = vector.multi_reduction <maximumf>, %25, %cst_23 [1] : vector<32x8xf32> to vector<32xf32>
    %27 = vector.shape_cast %26 : vector<32xf32> to vector<32x1xf32>
    %28 = vector.broadcast %27 : vector<32x1xf32> to vector<32x8xf32>
    %29 = arith.subf %25, %28 : vector<32x8xf32>
    %30 = math.exp %29 : vector<32x8xf32>
    %cst_24 = arith.constant dense<0.000000e+00> : vector<32xf32>
    %31 = vector.multi_reduction <add>, %30, %cst_24 [1] : vector<32x8xf32> to vector<32xf32>
    %32 = vector.shape_cast %31 : vector<32xf32> to vector<32x1xf32>
    %33 = vector.broadcast %32 : vector<32x1xf32> to vector<32x8xf32>
    %34 = arith.divf %30, %33 : vector<32x8xf32>
    %35 = vector.broadcast %19 : vector<32x1xf32> to vector<32x8xf32>
    %36 = arith.mulf %34, %35 : vector<32x8xf32>
    %37 = tpu.iota {dimensions = array<i32: 0>} : vector<8x8xi32>
    %38 = tpu.iota {dimensions = array<i32: 1>} : vector<8x8xi32>
    %39 = arith.cmpi eq, %37, %38 : vector<8x8xi32>
    %40 = tpu.iota {dimensions = array<i32: 0>} : vector<16x16xi32>
    %41 = tpu.iota {dimensions = array<i32: 1>} : vector<16x16xi32>
    %42 = arith.cmpi eq, %40, %41 : vector<16x16xi32>
    %43 = arith.extui %39 : vector<8x8xi1> to vector<8x8xi32>
    %44 = arith.sitofp %43 : vector<8x8xi32> to vector<8x8xf32>
    %45 = arith.extui %42 : vector<16x16xi1> to vector<16x16xi32>
    %46 = arith.sitofp %45 : vector<16x16xi32> to vector<16x16xf32>
    %47 = vector.extract_strided_slice %22 {offsets = [0, 0], sizes = [16, 32], strides = [1, 1]} : vector<32x32xf32> to vector<16x32xf32>
    %48 = vector.extract_strided_slice %36 {offsets = [0, 0], sizes = [16, 8], strides = [1, 1]} : vector<32x8xf32> to vector<16x8xf32>
    %c0_25 = arith.constant 0 : index
    %c0_26 = arith.constant 0 : index
    %c0_27 = arith.constant 0 : index
    %49 = vector.load %arg1[%c0_25, %c0_26, %c0_27] : memref<2x16x16xf32, #tpu.memory_space<vmem>>, vector<1x16x16xf32>
    %50 = vector.shape_cast %49 : vector<1x16x16xf32> to vector<16x16xf32>
    %51 = tpu.transpose %48, [1, 0] : vector<16x8xf32> -> vector<8x16xf32>
    %cst_28 = arith.constant dense<0.000000e+00> : vector<16xf32>
    %52 = vector.multi_reduction <add>, %50, %cst_28 [1] : vector<16x16xf32> to vector<16xf32>
    %53 = vector.shape_cast %52 : vector<16xf32> to vector<16x1xf32>
    %cst_29 = arith.constant dense<0.000000e+00> : vector<8x8xf32>
    %54 = tpu.matmul %51, %48, %cst_29 {dimension_numbers = #tpu.dot_dimension_numbers<[1], [0], [0], [1], [0, 0, 1, 1], [], []>} : vector<8x16xf32>, vector<16x8xf32>, vector<8x8xf32> -> vector<8x8xf32>
    %cst_30 = arith.constant dense<0.000000e+00> : vector<16x8xf32>
    %55 = tpu.matmul %50, %48, %cst_30 {dimension_numbers = #tpu.dot_dimension_numbers<[1], [0], [0], [1], [0, 0, 1, 1], [], []>} : vector<16x16xf32>, vector<16x8xf32>, vector<16x8xf32> -> vector<16x8xf32>
    %cst_31 = arith.constant dense<0.000000e+00> : vector<8x8xf32>
    %56 = tpu.matmul %51, %55, %cst_31 {dimension_numbers = #tpu.dot_dimension_numbers<[1], [0], [0], [1], [0, 0, 1, 1], [], []>} : vector<8x16xf32>, vector<16x8xf32>, vector<8x8xf32> -> vector<8x8xf32>
    %57 = vector.broadcast %53 : vector<16x1xf32> to vector<16x8xf32>
    %58 = arith.mulf %48, %57 : vector<16x8xf32>
    %cst_32 = arith.constant dense<0.000000e+00> : vector<8x8xf32>
    %59 = tpu.matmul %51, %58, %cst_32 {dimension_numbers = #tpu.dot_dimension_numbers<[1], [0], [0], [1], [0, 0, 1, 1], [], []>} : vector<8x16xf32>, vector<16x8xf32>, vector<8x8xf32> -> vector<8x8xf32>
    %60 = arith.mulf %56, %44 : vector<8x8xf32>
    %cst_33 = arith.constant dense<0.000000e+00> : vector<8xf32>
    %61 = vector.multi_reduction <add>, %60, %cst_33 [1] : vector<8x8xf32> to vector<8xf32>
    %62 = vector.shape_cast %61 : vector<8xf32> to vector<8x1xf32>
    %cst_34 = arith.constant dense<0.000000e+00> : vector<1xf32>
    %63 = vector.multi_reduction <add>, %62, %cst_34 [0] : vector<8x1xf32> to vector<1xf32>
    %64 = vector.shape_cast %63 : vector<1xf32> to vector<1x1xf32>
    %65 = arith.mulf %59, %44 : vector<8x8xf32>
    %cst_35 = arith.constant dense<0.000000e+00> : vector<8xf32>
    %66 = vector.multi_reduction <add>, %65, %cst_35 [1] : vector<8x8xf32> to vector<8xf32>
    %67 = vector.shape_cast %66 : vector<8xf32> to vector<8x1xf32>
    %cst_36 = arith.constant dense<0.000000e+00> : vector<1xf32>
    %68 = vector.multi_reduction <add>, %67, %cst_36 [0] : vector<8x1xf32> to vector<1xf32>
    %69 = vector.shape_cast %68 : vector<1xf32> to vector<1x1xf32>
    %70 = arith.subf %69, %64 : vector<1x1xf32>
    %cst_37 = arith.constant 1.000000e-15 : f32
    %71 = vector.broadcast %cst_37 : f32 to vector<1x1xf32>
    %72 = arith.addf %69, %71 : vector<1x1xf32>
    %73 = arith.divf %70, %72 : vector<1x1xf32>
    %74 = arith.mulf %54, %54 : vector<8x8xf32>
    %cst_38 = arith.constant dense<0.000000e+00> : vector<8xf32>
    %75 = vector.multi_reduction <add>, %74, %cst_38 [1] : vector<8x8xf32> to vector<8xf32>
    %76 = vector.shape_cast %75 : vector<8xf32> to vector<8x1xf32>
    %cst_39 = arith.constant dense<0.000000e+00> : vector<1xf32>
    %77 = vector.multi_reduction <add>, %76, %cst_39 [0] : vector<8x1xf32> to vector<1xf32>
    %78 = vector.shape_cast %77 : vector<1xf32> to vector<1x1xf32>
    %79 = math.sqrt %78 : vector<1x1xf32>
    %80 = vector.broadcast %79 : vector<1x1xf32> to vector<8x8xf32>
    %81 = arith.divf %54, %80 : vector<8x8xf32>
    %cst_40 = arith.constant 0.353553385 : f32
    %82 = vector.broadcast %cst_40 : f32 to vector<8x8xf32>
    %83 = arith.mulf %44, %82 : vector<8x8xf32>
    %84 = arith.subf %81, %83 : vector<8x8xf32>
    %85 = arith.mulf %84, %84 : vector<8x8xf32>
    %cst_41 = arith.constant dense<0.000000e+00> : vector<8xf32>
    %86 = vector.multi_reduction <add>, %85, %cst_41 [1] : vector<8x8xf32> to vector<8xf32>
    %87 = vector.shape_cast %86 : vector<8xf32> to vector<8x1xf32>
    %cst_42 = arith.constant dense<0.000000e+00> : vector<1xf32>
    %88 = vector.multi_reduction <add>, %87, %cst_42 [0] : vector<8x1xf32> to vector<1xf32>
    %89 = vector.shape_cast %88 : vector<1xf32> to vector<1x1xf32>
    %90 = math.sqrt %89 : vector<1x1xf32>
    %91 = arith.mulf %48, %48 : vector<16x8xf32>
    %cst_43 = arith.constant dense<0.000000e+00> : vector<16xf32>
    %92 = vector.multi_reduction <add>, %91, %cst_43 [1] : vector<16x8xf32> to vector<16xf32>
    %93 = vector.shape_cast %92 : vector<16xf32> to vector<16x1xf32>
    %cst_44 = arith.constant dense<0.000000e+00> : vector<16x16xf32>
    %94 = tpu.matmul %48, %51, %cst_44 {dimension_numbers = #tpu.dot_dimension_numbers<[1], [0], [0], [1], [0, 0, 1, 1], [], []>} : vector<16x8xf32>, vector<8x16xf32>, vector<16x16xf32> -> vector<16x16xf32>
    %95 = tpu.transpose %93, [1, 0] : vector<16x1xf32> -> vector<1x16xf32>
    %96 = vector.broadcast %93 : vector<16x1xf32> to vector<16x16xf32>
    %97 = vector.broadcast %95 : vector<1x16xf32> to vector<16x16xf32>
    %98 = arith.addf %96, %97 : vector<16x16xf32>
    %cst_45 = arith.constant 2.000000e+00 : f32
    %99 = vector.broadcast %cst_45 : f32 to vector<16x16xf32>
    %100 = arith.mulf %99, %94 : vector<16x16xf32>
    %101 = arith.subf %98, %100 : vector<16x16xf32>
    %cst_46 = arith.constant 0.000000e+00 : f32
    %102 = vector.broadcast %cst_46 : f32 to vector<16x16xf32>
    %103 = arith.maximumf %101, %102 : vector<16x16xf32>
    %104 = math.sqrt %103 : vector<16x16xf32>
    %105 = arith.mulf %104, %50 : vector<16x16xf32>
    %cst_47 = arith.constant dense<0.000000e+00> : vector<16xf32>
    %106 = vector.multi_reduction <add>, %105, %cst_47 [1] : vector<16x16xf32> to vector<16xf32>
    %107 = vector.shape_cast %106 : vector<16xf32> to vector<16x1xf32>
    %cst_48 = arith.constant 1.000000e-15 : f32
    %108 = vector.broadcast %cst_48 : f32 to vector<16x1xf32>
    %109 = arith.addf %107, %108 : vector<16x1xf32>
    %110 = math.rsqrt %109 : vector<16x1xf32>
    %111 = vector.broadcast %110 : vector<16x1xf32> to vector<16x16xf32>
    %112 = arith.mulf %105, %111 : vector<16x16xf32>
    %113 = tpu.transpose %110, [1, 0] : vector<16x1xf32> -> vector<1x16xf32>
    %114 = vector.broadcast %113 : vector<1x16xf32> to vector<16x16xf32>
    %115 = arith.mulf %112, %114 : vector<16x16xf32>
    %cst_49 = arith.constant dense<0.000000e+00> : vector<16x32xf32>
    %116 = tpu.matmul %115, %47, %cst_49 {dimension_numbers = #tpu.dot_dimension_numbers<[1], [0], [0], [1], [0, 0, 1, 1], [], []>} : vector<16x16xf32>, vector<16x32xf32>, vector<16x32xf32> -> vector<16x32xf32>
    %117 = vector.extract_strided_slice %22 {offsets = [16, 0], sizes = [16, 32], strides = [1, 1]} : vector<32x32xf32> to vector<16x32xf32>
    %118 = vector.extract_strided_slice %36 {offsets = [16, 0], sizes = [16, 8], strides = [1, 1]} : vector<32x8xf32> to vector<16x8xf32>
    %c1 = arith.constant 1 : index
    %c0_50 = arith.constant 0 : index
    %c0_51 = arith.constant 0 : index
    %119 = vector.load %arg1[%c1, %c0_50, %c0_51] : memref<2x16x16xf32, #tpu.memory_space<vmem>>, vector<1x16x16xf32>
    %120 = vector.shape_cast %119 : vector<1x16x16xf32> to vector<16x16xf32>
    %121 = tpu.transpose %118, [1, 0] : vector<16x8xf32> -> vector<8x16xf32>
    %cst_52 = arith.constant dense<0.000000e+00> : vector<16xf32>
    %122 = vector.multi_reduction <add>, %120, %cst_52 [1] : vector<16x16xf32> to vector<16xf32>
    %123 = vector.shape_cast %122 : vector<16xf32> to vector<16x1xf32>
    %cst_53 = arith.constant dense<0.000000e+00> : vector<8x8xf32>
    %124 = tpu.matmul %121, %118, %cst_53 {dimension_numbers = #tpu.dot_dimension_numbers<[1], [0], [0], [1], [0, 0, 1, 1], [], []>} : vector<8x16xf32>, vector<16x8xf32>, vector<8x8xf32> -> vector<8x8xf32>
    %cst_54 = arith.constant dense<0.000000e+00> : vector<16x8xf32>
    %125 = tpu.matmul %120, %118, %cst_54 {dimension_numbers = #tpu.dot_dimension_numbers<[1], [0], [0], [1], [0, 0, 1, 1], [], []>} : vector<16x16xf32>, vector<16x8xf32>, vector<16x8xf32> -> vector<16x8xf32>
    %cst_55 = arith.constant dense<0.000000e+00> : vector<8x8xf32>
    %126 = tpu.matmul %121, %125, %cst_55 {dimension_numbers = #tpu.dot_dimension_numbers<[1], [0], [0], [1], [0, 0, 1, 1], [], []>} : vector<8x16xf32>, vector<16x8xf32>, vector<8x8xf32> -> vector<8x8xf32>
    %127 = vector.broadcast %123 : vector<16x1xf32> to vector<16x8xf32>
    %128 = arith.mulf %118, %127 : vector<16x8xf32>
    %cst_56 = arith.constant dense<0.000000e+00> : vector<8x8xf32>
    %129 = tpu.matmul %121, %128, %cst_56 {dimension_numbers = #tpu.dot_dimension_numbers<[1], [0], [0], [1], [0, 0, 1, 1], [], []>} : vector<8x16xf32>, vector<16x8xf32>, vector<8x8xf32> -> vector<8x8xf32>
    %130 = arith.mulf %126, %44 : vector<8x8xf32>
    %cst_57 = arith.constant dense<0.000000e+00> : vector<8xf32>
    %131 = vector.multi_reduction <add>, %130, %cst_57 [1] : vector<8x8xf32> to vector<8xf32>
    %132 = vector.shape_cast %131 : vector<8xf32> to vector<8x1xf32>
    %cst_58 = arith.constant dense<0.000000e+00> : vector<1xf32>
    %133 = vector.multi_reduction <add>, %132, %cst_58 [0] : vector<8x1xf32> to vector<1xf32>
    %134 = vector.shape_cast %133 : vector<1xf32> to vector<1x1xf32>
    %135 = arith.mulf %129, %44 : vector<8x8xf32>
    %cst_59 = arith.constant dense<0.000000e+00> : vector<8xf32>
    %136 = vector.multi_reduction <add>, %135, %cst_59 [1] : vector<8x8xf32> to vector<8xf32>
    %137 = vector.shape_cast %136 : vector<8xf32> to vector<8x1xf32>
    %cst_60 = arith.constant dense<0.000000e+00> : vector<1xf32>
    %138 = vector.multi_reduction <add>, %137, %cst_60 [0] : vector<8x1xf32> to vector<1xf32>
    %139 = vector.shape_cast %138 : vector<1xf32> to vector<1x1xf32>
    %140 = arith.subf %139, %134 : vector<1x1xf32>
    %cst_61 = arith.constant 1.000000e-15 : f32
    %141 = vector.broadcast %cst_61 : f32 to vector<1x1xf32>
    %142 = arith.addf %139, %141 : vector<1x1xf32>
    %143 = arith.divf %140, %142 : vector<1x1xf32>
    %144 = arith.mulf %124, %124 : vector<8x8xf32>
    %cst_62 = arith.constant dense<0.000000e+00> : vector<8xf32>
    %145 = vector.multi_reduction <add>, %144, %cst_62 [1] : vector<8x8xf32> to vector<8xf32>
    %146 = vector.shape_cast %145 : vector<8xf32> to vector<8x1xf32>
    %cst_63 = arith.constant dense<0.000000e+00> : vector<1xf32>
    %147 = vector.multi_reduction <add>, %146, %cst_63 [0] : vector<8x1xf32> to vector<1xf32>
    %148 = vector.shape_cast %147 : vector<1xf32> to vector<1x1xf32>
    %149 = math.sqrt %148 : vector<1x1xf32>
    %150 = vector.broadcast %149 : vector<1x1xf32> to vector<8x8xf32>
    %151 = arith.divf %124, %150 : vector<8x8xf32>
    %cst_64 = arith.constant 0.353553385 : f32
    %152 = vector.broadcast %cst_64 : f32 to vector<8x8xf32>
    %153 = arith.mulf %44, %152 : vector<8x8xf32>
    %154 = arith.subf %151, %153 : vector<8x8xf32>
    %155 = arith.mulf %154, %154 : vector<8x8xf32>
    %cst_65 = arith.constant dense<0.000000e+00> : vector<8xf32>
    %156 = vector.multi_reduction <add>, %155, %cst_65 [1] : vector<8x8xf32> to vector<8xf32>
    %157 = vector.shape_cast %156 : vector<8xf32> to vector<8x1xf32>
    %cst_66 = arith.constant dense<0.000000e+00> : vector<1xf32>
    %158 = vector.multi_reduction <add>, %157, %cst_66 [0] : vector<8x1xf32> to vector<1xf32>
    %159 = vector.shape_cast %158 : vector<1xf32> to vector<1x1xf32>
    %160 = math.sqrt %159 : vector<1x1xf32>
    %161 = arith.mulf %118, %118 : vector<16x8xf32>
    %cst_67 = arith.constant dense<0.000000e+00> : vector<16xf32>
    %162 = vector.multi_reduction <add>, %161, %cst_67 [1] : vector<16x8xf32> to vector<16xf32>
    %163 = vector.shape_cast %162 : vector<16xf32> to vector<16x1xf32>
    %cst_68 = arith.constant dense<0.000000e+00> : vector<16x16xf32>
    %164 = tpu.matmul %118, %121, %cst_68 {dimension_numbers = #tpu.dot_dimension_numbers<[1], [0], [0], [1], [0, 0, 1, 1], [], []>} : vector<16x8xf32>, vector<8x16xf32>, vector<16x16xf32> -> vector<16x16xf32>
    %165 = tpu.transpose %163, [1, 0] : vector<16x1xf32> -> vector<1x16xf32>
    %166 = vector.broadcast %163 : vector<16x1xf32> to vector<16x16xf32>
    %167 = vector.broadcast %165 : vector<1x16xf32> to vector<16x16xf32>
    %168 = arith.addf %166, %167 : vector<16x16xf32>
    %cst_69 = arith.constant 2.000000e+00 : f32
    %169 = vector.broadcast %cst_69 : f32 to vector<16x16xf32>
    %170 = arith.mulf %169, %164 : vector<16x16xf32>
    %171 = arith.subf %168, %170 : vector<16x16xf32>
    %cst_70 = arith.constant 0.000000e+00 : f32
    %172 = vector.broadcast %cst_70 : f32 to vector<16x16xf32>
    %173 = arith.maximumf %171, %172 : vector<16x16xf32>
    %174 = math.sqrt %173 : vector<16x16xf32>
    %175 = arith.mulf %174, %120 : vector<16x16xf32>
    %cst_71 = arith.constant dense<0.000000e+00> : vector<16xf32>
    %176 = vector.multi_reduction <add>, %175, %cst_71 [1] : vector<16x16xf32> to vector<16xf32>
    %177 = vector.shape_cast %176 : vector<16xf32> to vector<16x1xf32>
    %cst_72 = arith.constant 1.000000e-15 : f32
    %178 = vector.broadcast %cst_72 : f32 to vector<16x1xf32>
    %179 = arith.addf %177, %178 : vector<16x1xf32>
    %180 = math.rsqrt %179 : vector<16x1xf32>
    %181 = vector.broadcast %180 : vector<16x1xf32> to vector<16x16xf32>
    %182 = arith.mulf %175, %181 : vector<16x16xf32>
    %183 = tpu.transpose %180, [1, 0] : vector<16x1xf32> -> vector<1x16xf32>
    %184 = vector.broadcast %183 : vector<1x16xf32> to vector<16x16xf32>
    %185 = arith.mulf %182, %184 : vector<16x16xf32>
    %cst_73 = arith.constant dense<0.000000e+00> : vector<16x32xf32>
    %186 = tpu.matmul %185, %117, %cst_73 {dimension_numbers = #tpu.dot_dimension_numbers<[1], [0], [0], [1], [0, 0, 1, 1], [], []>} : vector<16x16xf32>, vector<16x32xf32>, vector<16x32xf32> -> vector<16x32xf32>
    %187 = tpu.concatenate %116, %186 in 0 : vector<16x32xf32>, vector<16x32xf32> -> vector<32x32xf32>
    %cst_74 = arith.constant dense<0.000000e+00> : vector<32x32xf32>
    %188 = tpu.matmul %187, %4, %cst_74 {dimension_numbers = #tpu.dot_dimension_numbers<[1], [0], [0], [1], [0, 0, 1, 1], [], []>} : vector<32x32xf32>, vector<32x32xf32>, vector<32x32xf32> -> vector<32x32xf32>
    %189 = vector.broadcast %6 : vector<1x32xf32> to vector<32x32xf32>
    %190 = arith.addf %188, %189 : vector<32x32xf32>
    %cst_75 = arith.constant dense<0.000000e+00> : vector<32x32xf32>
    %191 = tpu.matmul %22, %5, %cst_75 {dimension_numbers = #tpu.dot_dimension_numbers<[1], [0], [0], [1], [0, 0, 1, 1], [], []>} : vector<32x32xf32>, vector<32x32xf32>, vector<32x32xf32> -> vector<32x32xf32>
    %192 = arith.addf %190, %191 : vector<32x32xf32>
    %cst_76 = arith.constant dense<0.000000e+00> : vector<32x16xf32>
    %193 = tpu.matmul %192, %7, %cst_76 {dimension_numbers = #tpu.dot_dimension_numbers<[1], [0], [0], [1], [0, 0, 1, 1], [], []>} : vector<32x32xf32>, vector<32x16xf32>, vector<32x16xf32> -> vector<32x16xf32>
    %194 = vector.broadcast %8 : vector<1x16xf32> to vector<32x16xf32>
    %195 = arith.addf %193, %194 : vector<32x16xf32>
    %cst_77 = arith.constant dense<0xFF800000> : vector<32xf32>
    %196 = vector.multi_reduction <maximumf>, %195, %cst_77 [1] : vector<32x16xf32> to vector<32xf32>
    %197 = vector.shape_cast %196 : vector<32xf32> to vector<32x1xf32>
    %198 = vector.broadcast %197 : vector<32x1xf32> to vector<32x16xf32>
    %199 = arith.subf %195, %198 : vector<32x16xf32>
    %200 = math.exp %199 : vector<32x16xf32>
    %cst_78 = arith.constant dense<0.000000e+00> : vector<32xf32>
    %201 = vector.multi_reduction <add>, %200, %cst_78 [1] : vector<32x16xf32> to vector<32xf32>
    %202 = vector.shape_cast %201 : vector<32xf32> to vector<32x1xf32>
    %203 = vector.broadcast %202 : vector<32x1xf32> to vector<32x16xf32>
    %204 = arith.divf %200, %203 : vector<32x16xf32>
    %205 = vector.broadcast %19 : vector<32x1xf32> to vector<32x16xf32>
    %206 = arith.mulf %204, %205 : vector<32x16xf32>
    %207 = vector.extract_strided_slice %192 {offsets = [0, 0], sizes = [16, 32], strides = [1, 1]} : vector<32x32xf32> to vector<16x32xf32>
    %208 = vector.extract_strided_slice %206 {offsets = [0, 0], sizes = [16, 16], strides = [1, 1]} : vector<32x16xf32> to vector<16x16xf32>
    %209 = vector.extract_strided_slice %19 {offsets = [0, 0], sizes = [16, 1], strides = [1, 1]} : vector<32x1xf32> to vector<16x1xf32>
    %210 = tpu.transpose %208, [1, 0] : vector<16x16xf32> -> vector<16x16xf32>
    %211 = vector.broadcast %209 : vector<16x1xf32> to vector<16x32xf32>
    %212 = arith.mulf %207, %211 : vector<16x32xf32>
    %cst_79 = arith.constant dense<0.000000e+00> : vector<16x32xf32>
    %213 = tpu.matmul %210, %212, %cst_79 {dimension_numbers = #tpu.dot_dimension_numbers<[1], [0], [0], [1], [0, 0, 1, 1], [], []>} : vector<16x16xf32>, vector<16x32xf32>, vector<16x32xf32> -> vector<16x32xf32>
    %cst_80 = arith.constant dense<0.000000e+00> : vector<16x16xf32>
    %214 = tpu.matmul %115, %208, %cst_80 {dimension_numbers = #tpu.dot_dimension_numbers<[1], [0], [0], [1], [0, 0, 1, 1], [], []>} : vector<16x16xf32>, vector<16x16xf32>, vector<16x16xf32> -> vector<16x16xf32>
    %cst_81 = arith.constant dense<0.000000e+00> : vector<16x16xf32>
    %215 = tpu.matmul %210, %214, %cst_81 {dimension_numbers = #tpu.dot_dimension_numbers<[1], [0], [0], [1], [0, 0, 1, 1], [], []>} : vector<16x16xf32>, vector<16x16xf32>, vector<16x16xf32> -> vector<16x16xf32>
    %cst_82 = arith.constant dense<0.000000e+00> : vector<16x16xf32>
    %216 = tpu.matmul %210, %208, %cst_82 {dimension_numbers = #tpu.dot_dimension_numbers<[1], [0], [0], [1], [0, 0, 1, 1], [], []>} : vector<16x16xf32>, vector<16x16xf32>, vector<16x16xf32> -> vector<16x16xf32>
    %cst_83 = arith.constant dense<0.000000e+00> : vector<16xf32>
    %217 = vector.multi_reduction <add>, %115, %cst_83 [1] : vector<16x16xf32> to vector<16xf32>
    %218 = vector.shape_cast %217 : vector<16xf32> to vector<16x1xf32>
    %219 = vector.broadcast %218 : vector<16x1xf32> to vector<16x16xf32>
    %220 = arith.mulf %208, %219 : vector<16x16xf32>
    %cst_84 = arith.constant dense<0.000000e+00> : vector<16x16xf32>
    %221 = tpu.matmul %210, %220, %cst_84 {dimension_numbers = #tpu.dot_dimension_numbers<[1], [0], [0], [1], [0, 0, 1, 1], [], []>} : vector<16x16xf32>, vector<16x16xf32>, vector<16x16xf32> -> vector<16x16xf32>
    %222 = arith.mulf %215, %46 : vector<16x16xf32>
    %cst_85 = arith.constant dense<0.000000e+00> : vector<16xf32>
    %223 = vector.multi_reduction <add>, %222, %cst_85 [1] : vector<16x16xf32> to vector<16xf32>
    %224 = vector.shape_cast %223 : vector<16xf32> to vector<16x1xf32>
    %cst_86 = arith.constant dense<0.000000e+00> : vector<1xf32>
    %225 = vector.multi_reduction <add>, %224, %cst_86 [0] : vector<16x1xf32> to vector<1xf32>
    %226 = vector.shape_cast %225 : vector<1xf32> to vector<1x1xf32>
    %227 = arith.mulf %221, %46 : vector<16x16xf32>
    %cst_87 = arith.constant dense<0.000000e+00> : vector<16xf32>
    %228 = vector.multi_reduction <add>, %227, %cst_87 [1] : vector<16x16xf32> to vector<16xf32>
    %229 = vector.shape_cast %228 : vector<16xf32> to vector<16x1xf32>
    %cst_88 = arith.constant dense<0.000000e+00> : vector<1xf32>
    %230 = vector.multi_reduction <add>, %229, %cst_88 [0] : vector<16x1xf32> to vector<1xf32>
    %231 = vector.shape_cast %230 : vector<1xf32> to vector<1x1xf32>
    %cst_89 = arith.constant 1.000000e-15 : f32
    %232 = vector.broadcast %cst_89 : f32 to vector<1x1xf32>
    %233 = arith.addf %231, %232 : vector<1x1xf32>
    %234 = arith.divf %226, %233 : vector<1x1xf32>
    %cst_90 = arith.constant 0.000000e+00 : f32
    %235 = vector.broadcast %cst_90 : f32 to vector<1x1xf32>
    %236 = arith.subf %235, %234 : vector<1x1xf32>
    %237 = arith.mulf %216, %216 : vector<16x16xf32>
    %cst_91 = arith.constant dense<0.000000e+00> : vector<16xf32>
    %238 = vector.multi_reduction <add>, %237, %cst_91 [1] : vector<16x16xf32> to vector<16xf32>
    %239 = vector.shape_cast %238 : vector<16xf32> to vector<16x1xf32>
    %cst_92 = arith.constant dense<0.000000e+00> : vector<1xf32>
    %240 = vector.multi_reduction <add>, %239, %cst_92 [0] : vector<16x1xf32> to vector<1xf32>
    %241 = vector.shape_cast %240 : vector<1xf32> to vector<1x1xf32>
    %242 = math.sqrt %241 : vector<1x1xf32>
    %243 = vector.broadcast %242 : vector<1x1xf32> to vector<16x16xf32>
    %244 = arith.divf %216, %243 : vector<16x16xf32>
    %cst_93 = arith.constant 2.500000e-01 : f32
    %245 = vector.broadcast %cst_93 : f32 to vector<16x16xf32>
    %246 = arith.mulf %46, %245 : vector<16x16xf32>
    %247 = arith.subf %244, %246 : vector<16x16xf32>
    %248 = arith.mulf %247, %247 : vector<16x16xf32>
    %cst_94 = arith.constant dense<0.000000e+00> : vector<16xf32>
    %249 = vector.multi_reduction <add>, %248, %cst_94 [1] : vector<16x16xf32> to vector<16xf32>
    %250 = vector.shape_cast %249 : vector<16xf32> to vector<16x1xf32>
    %cst_95 = arith.constant dense<0.000000e+00> : vector<1xf32>
    %251 = vector.multi_reduction <add>, %250, %cst_95 [0] : vector<16x1xf32> to vector<1xf32>
    %252 = vector.shape_cast %251 : vector<1xf32> to vector<1x1xf32>
    %253 = math.sqrt %252 : vector<1x1xf32>
    %254 = tpu.concatenate %73, %90, %236, %253 in 1 : vector<1x1xf32>, vector<1x1xf32>, vector<1x1xf32>, vector<1x1xf32> -> vector<1x4xf32>
    %cst_96 = arith.constant 0.000000e+00 : f32
    %255 = vector.broadcast %cst_96 : f32 to vector<16x16xf32>
    %256 = arith.select %42, %255, %215 : vector<16x16xi1>, vector<16x16xf32>
    %cst_97 = arith.constant dense<0.000000e+00> : vector<16xf32>
    %257 = vector.multi_reduction <add>, %256, %cst_97 [1] : vector<16x16xf32> to vector<16xf32>
    %258 = vector.shape_cast %257 : vector<16xf32> to vector<16x1xf32>
    %cst_98 = arith.constant 1.000000e-15 : f32
    %259 = vector.broadcast %cst_98 : f32 to vector<16x1xf32>
    %260 = arith.addf %258, %259 : vector<16x1xf32>
    %261 = math.rsqrt %260 : vector<16x1xf32>
    %262 = vector.broadcast %261 : vector<16x1xf32> to vector<16x16xf32>
    %263 = arith.mulf %256, %262 : vector<16x16xf32>
    %264 = tpu.transpose %261, [1, 0] : vector<16x1xf32> -> vector<1x16xf32>
    %265 = vector.broadcast %264 : vector<1x16xf32> to vector<16x16xf32>
    %266 = arith.mulf %263, %265 : vector<16x16xf32>
    %cst_99 = arith.constant dense<0.000000e+00> : vector<16x32xf32>
    %267 = tpu.matmul %266, %213, %cst_99 {dimension_numbers = #tpu.dot_dimension_numbers<[1], [0], [0], [1], [0, 0, 1, 1], [], []>} : vector<16x16xf32>, vector<16x32xf32>, vector<16x32xf32> -> vector<16x32xf32>
    %268 = vector.extract_strided_slice %192 {offsets = [16, 0], sizes = [16, 32], strides = [1, 1]} : vector<32x32xf32> to vector<16x32xf32>
    %269 = vector.extract_strided_slice %206 {offsets = [16, 0], sizes = [16, 16], strides = [1, 1]} : vector<32x16xf32> to vector<16x16xf32>
    %270 = vector.extract_strided_slice %19 {offsets = [16, 0], sizes = [16, 1], strides = [1, 1]} : vector<32x1xf32> to vector<16x1xf32>
    %271 = tpu.transpose %269, [1, 0] : vector<16x16xf32> -> vector<16x16xf32>
    %272 = vector.broadcast %270 : vector<16x1xf32> to vector<16x32xf32>
    %273 = arith.mulf %268, %272 : vector<16x32xf32>
    %cst_100 = arith.constant dense<0.000000e+00> : vector<16x32xf32>
    %274 = tpu.matmul %271, %273, %cst_100 {dimension_numbers = #tpu.dot_dimension_numbers<[1], [0], [0], [1], [0, 0, 1, 1], [], []>} : vector<16x16xf32>, vector<16x32xf32>, vector<16x32xf32> -> vector<16x32xf32>
    %cst_101 = arith.constant dense<0.000000e+00> : vector<16x16xf32>
    %275 = tpu.matmul %185, %269, %cst_101 {dimension_numbers = #tpu.dot_dimension_numbers<[1], [0], [0], [1], [0, 0, 1, 1], [], []>} : vector<16x16xf32>, vector<16x16xf32>, vector<16x16xf32> -> vector<16x16xf32>
    %cst_102 = arith.constant dense<0.000000e+00> : vector<16x16xf32>
    %276 = tpu.matmul %271, %275, %cst_102 {dimension_numbers = #tpu.dot_dimension_numbers<[1], [0], [0], [1], [0, 0, 1, 1], [], []>} : vector<16x16xf32>, vector<16x16xf32>, vector<16x16xf32> -> vector<16x16xf32>
    %cst_103 = arith.constant dense<0.000000e+00> : vector<16x16xf32>
    %277 = tpu.matmul %271, %269, %cst_103 {dimension_numbers = #tpu.dot_dimension_numbers<[1], [0], [0], [1], [0, 0, 1, 1], [], []>} : vector<16x16xf32>, vector<16x16xf32>, vector<16x16xf32> -> vector<16x16xf32>
    %cst_104 = arith.constant dense<0.000000e+00> : vector<16xf32>
    %278 = vector.multi_reduction <add>, %185, %cst_104 [1] : vector<16x16xf32> to vector<16xf32>
    %279 = vector.shape_cast %278 : vector<16xf32> to vector<16x1xf32>
    %280 = vector.broadcast %279 : vector<16x1xf32> to vector<16x16xf32>
    %281 = arith.mulf %269, %280 : vector<16x16xf32>
    %cst_105 = arith.constant dense<0.000000e+00> : vector<16x16xf32>
    %282 = tpu.matmul %271, %281, %cst_105 {dimension_numbers = #tpu.dot_dimension_numbers<[1], [0], [0], [1], [0, 0, 1, 1], [], []>} : vector<16x16xf32>, vector<16x16xf32>, vector<16x16xf32> -> vector<16x16xf32>
    %283 = arith.mulf %276, %46 : vector<16x16xf32>
    %cst_106 = arith.constant dense<0.000000e+00> : vector<16xf32>
    %284 = vector.multi_reduction <add>, %283, %cst_106 [1] : vector<16x16xf32> to vector<16xf32>
    %285 = vector.shape_cast %284 : vector<16xf32> to vector<16x1xf32>
    %cst_107 = arith.constant dense<0.000000e+00> : vector<1xf32>
    %286 = vector.multi_reduction <add>, %285, %cst_107 [0] : vector<16x1xf32> to vector<1xf32>
    %287 = vector.shape_cast %286 : vector<1xf32> to vector<1x1xf32>
    %288 = arith.mulf %282, %46 : vector<16x16xf32>
    %cst_108 = arith.constant dense<0.000000e+00> : vector<16xf32>
    %289 = vector.multi_reduction <add>, %288, %cst_108 [1] : vector<16x16xf32> to vector<16xf32>
    %290 = vector.shape_cast %289 : vector<16xf32> to vector<16x1xf32>
    %cst_109 = arith.constant dense<0.000000e+00> : vector<1xf32>
    %291 = vector.multi_reduction <add>, %290, %cst_109 [0] : vector<16x1xf32> to vector<1xf32>
    %292 = vector.shape_cast %291 : vector<1xf32> to vector<1x1xf32>
    %cst_110 = arith.constant 1.000000e-15 : f32
    %293 = vector.broadcast %cst_110 : f32 to vector<1x1xf32>
    %294 = arith.addf %292, %293 : vector<1x1xf32>
    %295 = arith.divf %287, %294 : vector<1x1xf32>
    %cst_111 = arith.constant 0.000000e+00 : f32
    %296 = vector.broadcast %cst_111 : f32 to vector<1x1xf32>
    %297 = arith.subf %296, %295 : vector<1x1xf32>
    %298 = arith.mulf %277, %277 : vector<16x16xf32>
    %cst_112 = arith.constant dense<0.000000e+00> : vector<16xf32>
    %299 = vector.multi_reduction <add>, %298, %cst_112 [1] : vector<16x16xf32> to vector<16xf32>
    %300 = vector.shape_cast %299 : vector<16xf32> to vector<16x1xf32>
    %cst_113 = arith.constant dense<0.000000e+00> : vector<1xf32>
    %301 = vector.multi_reduction <add>, %300, %cst_113 [0] : vector<16x1xf32> to vector<1xf32>
    %302 = vector.shape_cast %301 : vector<1xf32> to vector<1x1xf32>
    %303 = math.sqrt %302 : vector<1x1xf32>
    %304 = vector.broadcast %303 : vector<1x1xf32> to vector<16x16xf32>
    %305 = arith.divf %277, %304 : vector<16x16xf32>
    %cst_114 = arith.constant 2.500000e-01 : f32
    %306 = vector.broadcast %cst_114 : f32 to vector<16x16xf32>
    %307 = arith.mulf %46, %306 : vector<16x16xf32>
    %308 = arith.subf %305, %307 : vector<16x16xf32>
    %309 = arith.mulf %308, %308 : vector<16x16xf32>
    %cst_115 = arith.constant dense<0.000000e+00> : vector<16xf32>
    %310 = vector.multi_reduction <add>, %309, %cst_115 [1] : vector<16x16xf32> to vector<16xf32>
    %311 = vector.shape_cast %310 : vector<16xf32> to vector<16x1xf32>
    %cst_116 = arith.constant dense<0.000000e+00> : vector<1xf32>
    %312 = vector.multi_reduction <add>, %311, %cst_116 [0] : vector<16x1xf32> to vector<1xf32>
    %313 = vector.shape_cast %312 : vector<1xf32> to vector<1x1xf32>
    %314 = math.sqrt %313 : vector<1x1xf32>
    %315 = tpu.concatenate %143, %160, %297, %314 in 1 : vector<1x1xf32>, vector<1x1xf32>, vector<1x1xf32>, vector<1x1xf32> -> vector<1x4xf32>
    %cst_117 = arith.constant 0.000000e+00 : f32
    %316 = vector.broadcast %cst_117 : f32 to vector<16x16xf32>
    %317 = arith.select %42, %316, %276 : vector<16x16xi1>, vector<16x16xf32>
    %cst_118 = arith.constant dense<0.000000e+00> : vector<16xf32>
    %318 = vector.multi_reduction <add>, %317, %cst_118 [1] : vector<16x16xf32> to vector<16xf32>
    %319 = vector.shape_cast %318 : vector<16xf32> to vector<16x1xf32>
    %cst_119 = arith.constant 1.000000e-15 : f32
    %320 = vector.broadcast %cst_119 : f32 to vector<16x1xf32>
    %321 = arith.addf %319, %320 : vector<16x1xf32>
    %322 = math.rsqrt %321 : vector<16x1xf32>
    %323 = vector.broadcast %322 : vector<16x1xf32> to vector<16x16xf32>
    %324 = arith.mulf %317, %323 : vector<16x16xf32>
    %325 = tpu.transpose %322, [1, 0] : vector<16x1xf32> -> vector<1x16xf32>
    %326 = vector.broadcast %325 : vector<1x16xf32> to vector<16x16xf32>
    %327 = arith.mulf %324, %326 : vector<16x16xf32>
    %cst_120 = arith.constant dense<0.000000e+00> : vector<16x32xf32>
    %328 = tpu.matmul %327, %274, %cst_120 {dimension_numbers = #tpu.dot_dimension_numbers<[1], [0], [0], [1], [0, 0, 1, 1], [], []>} : vector<16x16xf32>, vector<16x32xf32>, vector<16x32xf32> -> vector<16x32xf32>
    %329 = tpu.concatenate %213, %274 in 0 : vector<16x32xf32>, vector<16x32xf32> -> vector<32x32xf32>
    %330 = tpu.concatenate %267, %328 in 0 : vector<16x32xf32>, vector<16x32xf32> -> vector<32x32xf32>
    %cst_121 = arith.constant dense<0.000000e+00> : vector<32x32xf32>
    %331 = tpu.matmul %330, %9, %cst_121 {dimension_numbers = #tpu.dot_dimension_numbers<[1], [0], [0], [1], [0, 0, 1, 1], [], []>} : vector<32x32xf32>, vector<32x32xf32>, vector<32x32xf32> -> vector<32x32xf32>
    %332 = vector.broadcast %11 : vector<1x32xf32> to vector<32x32xf32>
    %333 = arith.addf %331, %332 : vector<32x32xf32>
    %cst_122 = arith.constant dense<0.000000e+00> : vector<32x32xf32>
    %334 = tpu.matmul %329, %10, %cst_122 {dimension_numbers = #tpu.dot_dimension_numbers<[1], [0], [0], [1], [0, 0, 1, 1], [], []>} : vector<32x32xf32>, vector<32x32xf32>, vector<32x32xf32> -> vector<32x32xf32>
    %335 = arith.addf %333, %334 : vector<32x32xf32>
    %336 = vector.extract_strided_slice %335 {offsets = [0, 0], sizes = [16, 32], strides = [1, 1]} : vector<32x32xf32> to vector<16x32xf32>
    %cst_123 = arith.constant dense<0.000000e+00> : vector<32xf32>
    %337 = vector.multi_reduction <add>, %336, %cst_123 [0] : vector<16x32xf32> to vector<32xf32>
    %338 = vector.shape_cast %337 : vector<32xf32> to vector<1x32xf32>
    %339 = vector.extract_strided_slice %335 {offsets = [16, 0], sizes = [16, 32], strides = [1, 1]} : vector<32x32xf32> to vector<16x32xf32>
    %cst_124 = arith.constant dense<0.000000e+00> : vector<32xf32>
    %340 = vector.multi_reduction <add>, %339, %cst_124 [0] : vector<16x32xf32> to vector<32xf32>
    %341 = vector.shape_cast %340 : vector<32xf32> to vector<1x32xf32>
    %342 = tpu.concatenate %338, %341 in 0 : vector<1x32xf32>, vector<1x32xf32> -> vector<2x32xf32>
    %cst_125 = arith.constant dense<0.000000e+00> : vector<2x32xf32>
    %343 = tpu.matmul %342, %12, %cst_125 {dimension_numbers = #tpu.dot_dimension_numbers<[1], [0], [0], [1], [0, 0, 1, 1], [], []>} : vector<2x32xf32>, vector<32x32xf32>, vector<2x32xf32> -> vector<2x32xf32>
    %344 = vector.broadcast %13 : vector<1x32xf32> to vector<2x32xf32>
    %345 = arith.addf %343, %344 : vector<2x32xf32>
    %cst_126 = arith.constant 0.000000e+00 : f32
    %346 = vector.broadcast %cst_126 : f32 to vector<2x32xf32>
    %347 = arith.maximumf %345, %346 : vector<2x32xf32>
    %cst_127 = arith.constant dense<0.000000e+00> : vector<2x6xf32>
    %348 = tpu.matmul %347, %14, %cst_127 {dimension_numbers = #tpu.dot_dimension_numbers<[1], [0], [0], [1], [0, 0, 1, 1], [], []>} : vector<2x32xf32>, vector<32x6xf32>, vector<2x6xf32> -> vector<2x6xf32>
    %349 = vector.broadcast %15 : vector<1x6xf32> to vector<2x6xf32>
    %350 = arith.addf %348, %349 : vector<2x6xf32>
    %cst_128 = arith.constant dense<0xFF800000> : vector<2xf32>
    %351 = vector.multi_reduction <maximumf>, %350, %cst_128 [1] : vector<2x6xf32> to vector<2xf32>
    %352 = vector.shape_cast %351 : vector<2xf32> to vector<2x1xf32>
    %353 = vector.broadcast %352 : vector<2x1xf32> to vector<2x6xf32>
    %354 = arith.subf %350, %353 : vector<2x6xf32>
    %355 = math.exp %354 : vector<2x6xf32>
    %cst_129 = arith.constant dense<0.000000e+00> : vector<2xf32>
    %356 = vector.multi_reduction <add>, %355, %cst_129 [1] : vector<2x6xf32> to vector<2xf32>
    %357 = vector.shape_cast %356 : vector<2xf32> to vector<2x1xf32>
    %358 = math.log %357 : vector<2x1xf32>
    %359 = vector.broadcast %358 : vector<2x1xf32> to vector<2x6xf32>
    %360 = arith.subf %354, %359 : vector<2x6xf32>
    %361 = tpu.concatenate %254, %315 in 0 : vector<1x4xf32>, vector<1x4xf32> -> vector<2x4xf32>
    %cst_130 = arith.constant 0.000000e+00 : f32
    %362 = vector.broadcast %cst_130 : f32 to vector<2x118xf32>
    %363 = tpu.concatenate %360, %361, %362 in 1 : vector<2x6xf32>, vector<2x4xf32>, vector<2x118xf32> -> vector<2x128xf32>
    %c0_131 = arith.constant 0 : index
    %c0_132 = arith.constant 0 : index
    %c0_133 = arith.constant 0 : index
    %364 = vector.load %arg5[%c0_131, %c0_132, %c0_133] : memref<1x2x128xf32, #tpu.memory_space<vmem>>, vector<1x2x128xf32>
    %365 = vector.shape_cast %364 : vector<1x2x128xf32> to vector<2x128xf32>
    %366 = vector.shape_cast %363 : vector<2x128xf32> to vector<1x2x128xf32>
    tpu.vector_store %arg5[%c0_131, %c0_132, %c0_133], %366 {strides = array<i32>} : memref<1x2x128xf32, #tpu.memory_space<vmem>>, vector<1x2x128xf32>,
    return
  }
  func.func @transform_0(%arg0: i32) -> (i32, i32, i32) {
    %c0_i32 = arith.constant 0 : i32
    %c0_i32_0 = arith.constant 0 : i32
    %c0_i32_1 = arith.constant 0 : i32
    return %arg0, %c0_i32, %c0_i32_0 : i32, i32, i32
  }
  func.func @transform_1(%arg0: i32) -> (i32, i32, i32) {
    %c0_i32 = arith.constant 0 : i32
    %c0_i32_0 = arith.constant 0 : i32
    %c0_i32_1 = arith.constant 0 : i32
    return %arg0, %c0_i32, %c0_i32_0 : i32, i32, i32
  }
  func.func @transform_2(%arg0: i32) -> (i32, i32, i32) {
    %c0_i32 = arith.constant 0 : i32
    %c0_i32_0 = arith.constant 0 : i32
    %c0_i32_1 = arith.constant 0 : i32
    return %arg0, %c0_i32, %c0_i32_0 : i32, i32, i32
  }
  func.func @transform_3(%arg0: i32) -> (i32, i32) {
    %c0_i32 = arith.constant 0 : i32
    %c0_i32_0 = arith.constant 0 : i32
    %c0_i32_1 = arith.constant 0 : i32
    return %c0_i32, %c0_i32_0 : i32, i32
  }
  func.func @transform_4(%arg0: i32) -> (i32, i32, i32) {
    %c0_i32 = arith.constant 0 : i32
    %c0_i32_0 = arith.constant 0 : i32
    %c0_i32_1 = arith.constant 0 : i32
    return %arg0, %c0_i32, %c0_i32_0 : i32, i32, i32
  }
}

</mosaic_0001>

<bundles_post_ra>
// kernel: ctnet_forward.1
= control target key start
LH: loop header
LB: loop body
LE: loop exit
PB: predicated region body
PF: predicated region fallthrough
CT: control target
= control target key end

     0   :  { %9 = vsyncpa [#allocation3], 0  ;;  %s4394_s15 = smov [#allocation2]   ;;  %s5142_s0 = inlined_call_operand.hbm [shape: f32[2,16,16], index: 0, kind: input, shape index: {}]   ;;  %s5143_s1 = inlined_call_operand.vmem [shape: f32[2,16,4], index: 1, kind: input, shape index: {}]   ;;  %s5144_s2 = inlined_call_operand.vmem [shape: f32[2,16,1], index: 2, kind: input, shape index: {}]   ;;  %s5145_s3 = inlined_call_operand.vmem [shape: f32[320,128], index: 3, kind: input, shape index: {}]   ;;  %s5146_s4 = inlined_call_operand.vmem [shape: f32[1,2,128], index: 4, kind: output, shape index: {}]  }
   0x1   :  { %s15_s16 = sshll.u32 %s4394_s15, 4  ;;  %s16_s16 = int_to_ptr.vmem [resolvable:$true] %s15_s16 }
   0x2   :  { %s4380_s17 = scalar_lea.vmem %s16_s16, 512  ;;  %p4385_p1 = scmp.lt.s32.totalorder %s16_s16, %s16_s16 }
   0x3   :  { %p4381_p0 = scmp.ne.s32.totalorder %s16_s16, %s4380_s17  ;;  %p4386_p2 = scmp.lt.s32.totalorder %s4380_s17, %s4380_s17 }
   0x5   :  { %p4387_p3 = por %p4386_p2, %p4385_p1 }
   0x7   :  { %p4388_p4 = pnand %p4387_p3, %p4381_p0 }
   0x9   :  { %4391 = shalt.err (!%p4388_p4)
}
   0xa   :  { %s4395_s18 = smov 128   ;;  %s4396_s19 = smov 8  }
   0xb   :  { %21 = dma.hbm_to_vmem [thread:$0]  %s5142_s0, 512, %s16_s16, [#allocation3], %s4395_s18, %s4395_s18, %s4396_s19  }
   0xc   :  { %4392 = dma.done.wait [#allocation3], 512  }
   0xd   :  { %4393 = vsyncadd [#allocation3], 4294966784  ;;  %vm96_vm0 = vcmask 1043456   ;;  %vm83_vm1 = vcmask 31744   ;;  %v31_v0 = vld [vmem:[%s5145_s3] sm:$0xf] }
   0xe   :  { %v71_v1 = vld [vmem:[%s5143_s1] sm:$0xff]  ;;  %v72_v2 = vld [vmem:[%s5143_s1 + $0x8] sm:$0xff]  ;;  %3993 = vmatprep.subr.msk.mxu0 %vm96_vm0, %v31_v0  ;;  %v34_v5 = vld [vmem:[%s5145_s3 + $0x18] sm:$0xff]  ;;  %vm189_vm2 = vcmask 261120   ;;  %vm287_vm3 = vcmask 64512   ;;  %v4397_v21 = vmov 0  }
   0xf   :  { %3995 = vmatprep.mubr.msk.f32.mxu0 %vm83_vm1, %v71_v1  ;;  %v36_v3 = vld [vmem:[%s5145_s3 + $0x28] sm:$0xff]  ;;  %3994 = vmatpush3.msk.msra.mxu0 %vm96_vm0, %v31_v0  ;;  %v35_v4 = vld [vmem:[%s5145_s3 + $0x20] sm:$0xff]  ;;  %v33_v6 = vld [vmem:[%s5145_s3 + $0x10] sm:$0xff]  ;;  %v4398_v38 = vmov 0.0   ;;  %vm4399_vm4 = vmmov 0   ;;  %vm401_vm5 = vcmask 130048  }
  0x10   :  { %4001 = vmatprep.subr.mxu1 %v36_v3  ;;  %3996 = vmatmul.mubr.msk.f32.vlgmr.msra.gmra.mxu0 %vm83_vm1, %v72_v2  ;;  %v3760_v8 = vld [vmem:[%s5145_s3 + $0x8] ss:$0 sm:$0xff]  ;;  %v73_v12 = vld [vmem:[%s5143_s1 + $0x10] sm:$0xff]  ;;  %v74_v13 = vld [vmem:[%s5143_s1 + $0x18] sm:$0xff] }
  0x11   :  { %4002 = vmatpush3.msra.mxu1 %v36_v3  ;;  %3998 = vmatprep.mubr.msk.f32.mxu0 %vm83_vm1, %v73_v12  ;;  %v4474_v15 = vld [vmem:[%s5145_s3 + $0x30] ss:$0 sm:$0xff]  ;;  %v75_v22 = vld [vmem:[%s5144_s2] sm:$0xff]  ;;  %v76_v37 = vld [vmem:[%s5144_s2 + $0x8] sm:$0xff] }
  0x12   :  { %4003 = vmatprep.subr.mxu1 %v35_v4  ;;  %4279 = vset.pattern.permute.xlu1 %v4397_v21  ;;  %v4528_v59 = vld [vmem:[#allocation2] sm:$0xff]  ;;  %v4537_v61 = vld [vmem:[#allocation2 + $0x8] sm:$0xff] }
  0x13   :  { %4004 = vmatpush3.msra.mxu1 %v35_v4  ;;  %4278 = vset.pattern.permute.xlu0 %v4397_v21  ;;  %v405_v12 = vsel %vm401_vm5, %v4537_v61, 0.0 }
  0x14   :  { %4005 = vmatprep.subr.mxu1 %v34_v5  ;;  %3999 = vmatmul.mubr.msk.f32.gmra.mxu0 %vm83_vm1, %v74_v13 }
  0x15   :  { %4006 = vmatpush3.msra.mxu1 %v34_v5  ;;  %4015 = vmatprep.subr.mxu0 %v4398_v38 }
  0x16   :  { %4007 = vmatprep.subr.mxu1 %v33_v6  ;;  %4019 = vmatprep.mubr.msk.f32.mxu0 %vm4399_vm4, %v4398_v38 }
  0x17   :  { %4008 = vmatpush3.msra.mxu1 %v33_v6 }
  0x18   :  { %4029 = vmatprep.subr.mxu1 %v4398_v38 }
  0xd0   :  { %v3997_v7 = vpop.f32.mrf.mxu0 }
  0xd1   :  { %v4457_v11 = vadd.f32 %v3997_v7, %v3760_v8 }
  0xd2   :  { %v166_v9 = vpop.f32.mrf.mxu0 }
  0xd3   :  { %v4455_v10 = vadd.f32 %v3760_v8, %v166_v9 }
  0xd4   :  { %v4000_v23 = vpop.f32.mrf.mxu0 }
  0xd5   :  { %4009 = vmatprep.mubr.msk.f32.mxu1 %vm189_vm2, %v4455_v10  ;;  %v4483_v24 = vadd.f32 %v4000_v23, %v3760_v8 }
  0xd6   :  { %4010 = vmatmul.mubr.msk.f32.vlgmr.msra.gmra.mxu1 %vm189_vm2, %v4457_v11  ;;  %v176_v25 = vpop.f32.mrf.mxu0 }
  0xd7   :  { %v4485_v26 = vadd.f32 %v3760_v8, %v176_v25 }
  0xd9   :  { %4012 = vmatprep.mubr.msk.f32.mxu1 %vm189_vm2, %v4485_v26 }
  0xda   :  { %4013 = vmatmul.mubr.msk.f32.gmra.mxu1 %vm189_vm2, %v4483_v24 }
  0xdb   :  { %4033 = vmatprep.mubr.msk.f32.mxu1 %vm4399_vm4, %v4398_v38 }
 0x196   :  { %v4011_v14 = vpop.f32.mrf.mxu1 }
 0x197   :  { %v274_v18 = vadd.f32 %v4011_v14, %v4474_v15 }
 0x198   :  { %v268_v16 = vpop.f32.mrf.mxu1 }
 0x199   :  { %v269_v17 = vadd.f32 %v4474_v15, %v268_v16  ;;  %v291_v20 = vsel %vm287_vm3, %v274_v18, -inf }
 0x19a   :  { %v4014_v51 = vpop.f32.mrf.mxu1 }
 0x19b   :  { %v288_v19 = vsel %vm287_vm3, %v269_v17, -inf  ;;  %v284_v53 = vadd.f32 %v4014_v51, %v4474_v15 }
 0x19c   :  { %289 = vmax.xlane.f32.xlu0 %v288_v19  ;;  %v278_v54 = vpop.f32.mrf.mxu1 }
 0x19d   :  { %v279_v56 = vadd.f32 %v4474_v15, %v278_v54  ;;  %v297_v57 = vsel %vm287_vm3, %v284_v53, -inf }
 0x19f   :  { %v294_v58 = vsel %vm287_vm3, %v279_v56, -inf }
 0x1a0   :  { %292 = vmax.xlane.f32.xlu0 %v291_v20  ;;  %v356_v20 = vlaneseq }
 0x1a2   :  { %v4573_v21 = vshrl.u32 %v356_v20, 7 }
 0x1b6   :  { %334 = vperm.xlu0 %4278, %v75_v22   ;;  %v4576_v22 = vsub.s32 0, %v4573_v21 }
 0x225   :  { %v290_v27 = vpop.xlane.xlu0 %289 }
 0x226   :  { %v300_v28 = vsub.f32 %v269_v17, %v290_v27 }
 0x228   :  { %v304_v31 = vmul.f32 1.442695, %v300_v28 }
 0x229   :  { %v293_v29 = vpop.xlane.xlu0 %292 }
 0x22a   :  { %v301_v30 = vsub.f32 %v274_v18, %v293_v29 }
 0x22c   :  { %v306_v32 = vmul.f32 1.442695, %v301_v30 }
 0x22e   :  { %4280 = vpow2.f32 %v306_v32 }
 0x22f   :  { %4282 = vpow2.f32 %v304_v31 }
 0x231   :  { %v4507_v46 = vpop.permute.xlu0 %334 }
 0x23b   :  { %v4281_v33 = vpop.eup %4280 }
 0x23c   :  { %v315_v34 = vsel %vm287_vm3, %v4281_v33, 0.0  ;;  %v4283_v35 = vpop.eup %4282 }
 0x23d   :  { %316 = vadd.xlane.f32.xlu1 %v315_v34  ;;  %v312_v36 = vsel %vm287_vm3, %v4283_v35, 0.0 }
 0x241   :  { %313 = vadd.xlane.f32.xlu1 %v312_v36 }
 0x252   :  { %339 = vperm.xlu1 %4279, %v76_v37  }
 0x2c6   :  { %v317_v39 = vpop.xlane.xlu1 %316 }
 0x2c7   :  { %4284 = vrcp.f32 %v317_v39 }
 0x2ca   :  { %v314_v40 = vpop.xlane.xlu1 %313 }
 0x2cb   :  { %4286 = vrcp.f32 %v314_v40 }
 0x2ce   :  { %v4502_v42 = vpop.permute.xlu1 %339 }
 0x2d4   :  { %v4285_v41 = vpop.eup %4284 }
 0x2d5   :  { %v327_v43 = vmul.f32 %v4285_v41, %v4281_v33 }
 0x2d7   :  { %v4505_v44 = vmul.f32 %v4502_v42, %v327_v43 }
 0x2d8   :  { %v4287_v45 = vpop.eup %4286 }
 0x2d9   :  { %4016 = vmatpush3.msra.mxu0 %v4505_v44  ;;  %v325_v47 = vmul.f32 %v4287_v45, %v4283_v35  ;;  %v767_v52 = vmul.f32 %v4505_v44, %v4505_v44 }
 0x2da   :  { %4017 = vmatprep.subr.mxu0 %v4398_v38 }
 0x2db   :  { %v4512_v48 = vmul.f32 %v4507_v46, %v325_v47  ;;  %v771_v55 = vsel %vm287_vm3, %v767_v52, 0.0 }
 0x2dd   :  { %369 = vxpose.xlu1.b32.start [1/2] (short) (narrow) %v4512_v48, 8  ;;  %4018 = vmatpush3.msra.mxu0 %v4512_v48  ;;  %v766_v49 = vmul.f32 %v4512_v48, %v4512_v48 }
 0x2de   :  { %4022 = vmatprep.subr.mxu0 %v4505_v44 }
 0x2df   :  { %v768_v50 = vsel %vm287_vm3, %v766_v49, 0.0 }
 0x2e0   :  { %769 = vadd.xlane.f32.xlu0 %v768_v50 }
 0x2e1   :  { %370 = vxpose.xlu1.b32.end [2/2] (short) (narrow) %v4505_v44, 8 }
 0x308   :  { %772 = vadd.xlane.f32.xlu1 %v771_v55 }
 0x30c   :  { %298 = vmax.xlane.f32.xlu1 %v297_v57  ;;  %v78_v57 = vld [vmem:[%s5144_s2 + $0x18] sm:$0xff] }
 0x310   :  { %295 = vmax.xlane.f32.xlu1 %v294_v58  ;;  %v77_v58 = vld [vmem:[%s5144_s2 + $0x10] sm:$0xff] }
 0x359   :  { %v4530_v60 = vpop.trf.xlu1 }
 0x35a   :  { %4020 = vmatmul.mubr.msk.f32.vlgmr.msra.gmra.mxu0 %vm401_vm5, %v4530_v60 }
 0x35b   :  { %4023 = vmatpush3.msra.mxu0 %v4505_v44  ;;  %4026 = vmatprep.mubr.msk.f32.mxu0 %vm401_vm5, %v4528_v59 }
 0x35c   :  { %4024 = vmatprep.subr.mxu0 %v4512_v48 }
 0x35d   :  { %4025 = vmatpush3.msra.mxu0 %v4512_v48 }
 0x35e   :  { %4027 = vmatmul.mubr.msk.f32.vlgmr.msra.gmra.mxu0 %vm401_vm5, %v4537_v61  ;;  %4036 = vmatprep.subr.mxu0 %v4398_v38 }
 0x35f   :  { %4040 = vmatprep.mubr.msk.f32.mxu0 %vm4399_vm4, %v4398_v38 }
 0x369   :  { %v770_v62 = vpop.xlane.xlu0 %769 }
 0x36a   :  { %855 = vxpose.xlu0.b32.start [1/2] (short) (narrow) %v770_v62, 8 }
 0x391   :  { %v773_v63 = vpop.xlane.xlu1 %772 }
 0x392   :  { %856 = vxpose.xlu0.b32.end [2/2] (short) (narrow) %v773_v63, 8 }
 0x395   :  { %v299_v0 = vpop.xlane.xlu1 %298 }
 0x396   :  { %v303_v1 = vsub.f32 %v284_v53, %v299_v0 }
 0x398   :  { %v310_v2 = vmul.f32 1.442695, %v303_v1 }
 0x399   :  { %v296_v3 = vpop.xlane.xlu1 %295 }
 0x39a   :  { %4288 = vpow2.f32 %v310_v2  ;;  %v302_v4 = vsub.f32 %v279_v56, %v296_v3  ;;  %v402_v56 = vsel %vm401_vm5, %v4528_v59, 0.0 }
 0x39c   :  { %v308_v5 = vmul.f32 1.442695, %v302_v4 }
 0x39e   :  { %4290 = vpow2.f32 %v308_v5 }
 0x3a7   :  { %v4546_v6 = vpop.eup %4288 }
 0x3a8   :  { %v321_v7 = vsel %vm287_vm3, %v4546_v6, 0.0 }
 0x3a9   :  { %322 = vadd.xlane.f32.xlu1 %v321_v7 }
 0x3ab   :  { %v4550_v8 = vpop.eup %4290 }
 0x3ac   :  { %v318_v9 = vsel %vm287_vm3, %v4550_v8, 0.0 }
 0x3ad   :  { %319 = vadd.xlane.f32.xlu1 %v318_v9 }
 0x3bf   :  { %406 = vadd.xlane.f32.xlu0 %v405_v12 }
 0x40a   :  { %v871_v17 = vpop.trf.xlu0 }
 0x40b   :  { %v890_v25 = vrot.slane %v871_v17, %v4576_v22 }
 0x40d   :  { %v892_v29 = vadd.f32 %v890_v25, %v773_v63  ;;  %v891_v32 = vadd.f32 %v890_v25, %v770_v62 }
 0x41a   :  { %v4556_v13 = vpop.f32.mrf.mxu0 }
 0x41c   :  { %v4021_v14 = vpop.f32.mrf.mxu0 }
 0x41e   :  { %v4028_v15 = vpop.f32.mrf.mxu0 }
 0x41f   :  { %4030 = vmatpush3.msra.mxu1 %v4028_v15 }
 0x420   :  { %v553_v16 = vpop.f32.mrf.mxu0  ;;  %4031 = vmatprep.subr.mxu1 %v4398_v38 }
 0x421   :  { %4032 = vmatpush3.msra.mxu1 %v553_v16 }
 0x422   :  { %4034 = vmatmul.mubr.msk.f32.vlgmr.msra.gmra.mxu1 %vm401_vm5, %v4530_v60  ;;  %4043 = vmatprep.subr.mxu1 %v4530_v60 }
 0x423   :  { %4044 = vmatpush3.msra.mxu1 %v4530_v60  ;;  %4045 = vmatprep.mubr.msk.f32.mxu1 %vm287_vm3, %v4512_v48 }
 0x424   :  { %4055 = vmatprep.subr.mxu1 %v4398_v38 }
 0x426   :  { %4046 = vmatmul.mubr.msk.f32.vlgmr.msra.gmra.mxu1 %vm287_vm3, %v4505_v44 }
 0x427   :  { %4059 = vmatprep.mubr.msk.f32.mxu1 %vm4399_vm4, %v4398_v38 }
 0x448   :  { %v407_v18 = vpop.xlane.xlu0 %406 }
 0x449   :  { %v633_v19 = vmul.f32 %v407_v18, %v4505_v44 }
 0x44b   :  { %4037 = vmatpush3.msra.mxu0 %v633_v19 }
 0x44c   :  { %4038 = vmatprep.subr.mxu0 %v4398_v38 }
 0x4e2   :  { %v4578_v23 = vpop.f32.mrf.mxu1 }
 0x4e4   :  { %v4035_v27 = vpop.f32.mrf.mxu1 }
 0x4e6   :  { %v4047_v28 = vpop.f32.mrf.mxu1 }
 0x4e7   :  { %v894_v30 = vmul.f32 2.0, %v4047_v28 }
 0x4e8   :  { %v846_v31 = vpop.f32.mrf.mxu1 }
 0x4e9   :  { %v896_v33 = vsub.f32 %v892_v29, %v894_v30  ;;  %v893_v34 = vmul.f32 2.0, %v846_v31 }
 0x4eb   :  { %v898_v35 = vmax.f32 %v896_v33, 0.0  ;;  %v895_v36 = vsub.f32 %v891_v32, %v893_v34  ;;  %v4640_v32 = vld [vmem:[#allocation2 + $0x10] sm:$0xff]  ;;  %v4649_v33 = vld [vmem:[#allocation2 + $0x18] sm:$0xff] }
 0x4ed   :  { %4292 = vrsqrt.f32 %v898_v35  ;;  %v897_v37 = vmax.f32 %v895_v36, 0.0  ;;  %vm908_vm6 = vcmp.eq.f32.partialorder %v898_v35, inf  ;;  %v911_v43 = vand.u32 2147483648, %v898_v35 }
 0x4ee   :  { %vm910_vm7 = vcmp.eq.f32.partialorder %v898_v35, 0.0 }
 0x4ef   :  { %4294 = vrsqrt.f32 %v897_v37  ;;  %vm901_vm8 = vcmp.eq.f32.partialorder %v897_v37, inf  ;;  %v904_v49 = vand.u32 2147483648, %v897_v37  ;;  %vm903_vm9 = vcmp.eq.f32.partialorder %v897_v37, 0.0 }
 0x4fa   :  { %v4293_v39 = vpop.eup %4292 }
 0x4fb   :  { %v907_v40 = vmul.f32 %v4293_v39, %v898_v35 }
 0x4fc   :  { %v4295_v41 = vpop.eup %4294 }
 0x4fd   :  { %v909_v44 = vsel %vm908_vm6, %v898_v35, %v907_v40  ;;  %v900_v45 = vmul.f32 %v4295_v41, %v897_v37 }
 0x4fe   :  { %v912_v47 = vsel %vm910_vm7, %v911_v43, %v909_v44 }
 0x4ff   :  { %v4582_v50 = vmul.f32 %v912_v47, %v4537_v61  ;;  %v902_v51 = vsel %vm901_vm8, %v897_v37, %v900_v45  ;;  %v323_v61 = vpop.xlane.xlu1 %322  ;;  %v41_v47 = vld [vmem:[%s5145_s3 + $0x50] sm:$0xff] }
 0x500   :  { %v905_v52 = vsel %vm903_vm9, %v904_v49, %v902_v51  ;;  %4296 = vrcp.f32 %v323_v61  ;;  %v40_v49 = vld [vmem:[%s5145_s3 + $0x48] sm:$0xff]  ;;  %v38_v51 = vld [vmem:[%s5145_s3 + $0x38] sm:$0xff] }
 0x501   :  { %v918_v53 = vsel %vm401_vm5, %v4582_v50, 0.0  ;;  %v913_v54 = vmul.f32 %v905_v52, %v4528_v59 }
 0x502   :  { %919 = vadd.xlane.f32.xlu1 %v918_v53 }
 0x503   :  { %v915_v55 = vsel %vm401_vm5, %v913_v54, 0.0  ;;  %v320_v62 = vpop.xlane.xlu1 %319 }
 0x504   :  { %4298 = vrcp.f32 %v320_v62 }
 0x506   :  { %916 = vadd.xlane.f32.xlu1 %v915_v55 }
 0x50a   :  { %403 = vadd.xlane.f32.xlu1 %v402_v56 }
 0x50d   :  { %v4297_v59 = vpop.eup %4296 }
 0x50e   :  { %v331_v5 = vmul.f32 %v4297_v59, %v4546_v6 }
 0x511   :  { %v4299_v7 = vpop.eup %4298 }
 0x51b   :  { %349 = vperm.xlu1 %4279, %v78_v57  }
 0x51f   :  { %344 = vperm.xlu1 %4279, %v77_v58  }
 0x58b   :  { %v920_v63 = vpop.xlane.xlu1 %919 }
 0x58c   :  { %v922_v2 = vadd.f32 1e-15, %v920_v63 }
 0x58f   :  { %v917_v0 = vpop.xlane.xlu1 %916 }
 0x590   :  { %v921_v1 = vadd.f32 1e-15, %v917_v0 }
 0x592   :  { %4300 = vrsqrt.f32 %v921_v1 }
 0x593   :  { %v404_v3 = vpop.xlane.xlu1 %403  ;;  %4302 = vrsqrt.f32 %v922_v2 }
 0x594   :  { %v632_v4 = vmul.f32 %v404_v3, %v4512_v48  ;;  %v329_v48 = vmul.f32 %v4299_v7, %v4550_v8 }
 0x596   :  { %4039 = vmatpush3.msra.mxu0 %v632_v4 }
 0x597   :  { %4041 = vmatmul.mubr.msk.f32.vlgmr.msra.gmra.mxu0 %vm401_vm5, %v4530_v60  ;;  %4048 = vmatprep.subr.mxu0 %v4457_v11  ;;  %v4601_v9 = vpop.permute.xlu1 %349 }
 0x598   :  { %v4604_v12 = vmul.f32 %v4601_v9, %v331_v5  ;;  %4049 = vmatpush3.msra.mxu0 %v4457_v11 }
 0x599   :  { %4050 = vmatprep.subr.mxu0 %v4455_v10 }
 0x59a   :  { %4051 = vmatpush3.msra.mxu0 %v4455_v10  ;;  %4056 = vmatpush3.msra.mxu1 %v4604_v12  ;;  %v1445_v17 = vmul.f32 %v4604_v12, %v4604_v12 }
 0x59b   :  { %4062 = vmatprep.subr.mxu0 %v4604_v12  ;;  %v4612_v60 = vpop.permute.xlu1 %344  ;;  %4057 = vmatprep.subr.mxu1 %v4398_v38 }
 0x59c   :  { %v4616_v6 = vmul.f32 %v4612_v60, %v329_v48  ;;  %v1449_v18 = vsel %vm287_vm3, %v1445_v17, 0.0 }
 0x59e   :  { %1049 = vxpose.xlu0.b32.start [1/2] (short) (narrow) %v4616_v6, 8  ;;  %4058 = vmatpush3.msra.mxu1 %v4616_v6  ;;  %v1444_v15 = vmul.f32 %v4616_v6, %v4616_v6 }
 0x59f   :  { %v4301_v14 = vpop.eup %4300  ;;  %4069 = vmatprep.subr.mxu1 %v4398_v38 }
 0x5a0   :  { %927 = vxpose.xlu1.b32.start [1/2] (short) (narrow) %v4301_v14, 8  ;;  %v4303_v8 = vpop.eup %4302  ;;  %v1446_v16 = vsel %vm287_vm3, %v1444_v15, 0.0  ;;  %v925_v27 = vmul.f32 %v4301_v14, %v913_v54 }
 0x5a1   :  { %v926_v28 = vmul.f32 %v4303_v8, %v4582_v50  ;;  %v39_v50 = vld [vmem:[%s5145_s3 + $0x40] sm:$0xff] }
 0x5a2   :  { %1050 = vxpose.xlu0.b32.end [2/2] (short) (narrow) %v4604_v12, 8 }
 0x5a4   :  { %928 = vxpose.xlu1.b32.end [2/2] (short) (narrow) %v4303_v8, 8 }
 0x5cb   :  { %1447 = vadd.xlane.f32.xlu1 %v1446_v16 }
 0x5cf   :  { %1450 = vadd.xlane.f32.xlu0 %v1449_v18 }
 0x61a   :  { %v4628_v19 = vpop.trf.xlu0 }
 0x61b   :  { %4060 = vmatmul.mubr.msk.f32.vlgmr.msra.gmra.mxu1 %vm401_vm5, %v4628_v19 }
 0x61c   :  { %v943_v25 = vpop.trf.xlu1  ;;  %4073 = vmatprep.mubr.msk.f32.mxu1 %vm4399_vm4, %v4398_v38 }
 0x61d   :  { %v962_v29 = vrot.slane %v943_v25, %v4576_v22 }
 0x61f   :  { %v4636_v30 = vmul.f32 %v962_v29, %v925_v27  ;;  %v4638_v31 = vmul.f32 %v962_v29, %v926_v28  ;;  %v1084_v29 = vsel %vm401_vm5, %v4649_v33, 0.0 }
 0x621   :  { %4052 = vmatprep.mubr.msk.f32.mxu0 %vm401_vm5, %v4636_v30 }
 0x622   :  { %4053 = vmatmul.mubr.msk.f32.vlgmr.msra.gmra.mxu0 %vm401_vm5, %v4638_v31 }
 0x623   :  { %4063 = vmatpush3.msra.mxu0 %v4604_v12  ;;  %4066 = vmatprep.mubr.msk.f32.mxu0 %vm401_vm5, %v4640_v32 }
 0x624   :  { %4064 = vmatprep.subr.mxu0 %v4616_v6 }
 0x625   :  { %4065 = vmatpush3.msra.mxu0 %v4616_v6 }
 0x626   :  { %4067 = vmatmul.mubr.msk.f32.vlgmr.msra.gmra.mxu0 %vm401_vm5, %v4649_v33  ;;  %4076 = vmatprep.subr.mxu0 %v4398_v38 }
 0x627   :  { %4080 = vmatprep.mubr.msk.f32.mxu0 %vm4399_vm4, %v4398_v38 }
 0x654   :  { %v1448_v34 = vpop.xlane.xlu1 %1447 }
 0x655   :  { %1533 = vxpose.xlu1.b32.start [1/2] (short) (narrow) %v1448_v34, 8 }
 0x657   :  { %v4658_v35 = vpop.f32.mrf.mxu0 }
 0x658   :  { %v1451_v36 = vpop.xlane.xlu0 %1450 }
 0x659   :  { %v4042_v37 = vpop.f32.mrf.mxu0  ;;  %1534 = vxpose.xlu1.b32.end [2/2] (short) (narrow) %v1451_v36, 8 }
 0x6d1   :  { %v1549_v52 = vpop.trf.xlu1 }
 0x6d2   :  { %v1568_v54 = vrot.slane %v1549_v52, %v4576_v22 }
 0x6d4   :  { %v1570_v57 = vadd.f32 %v1568_v54, %v1451_v36  ;;  %v1569_v62 = vadd.f32 %v1568_v54, %v1448_v34  ;;  %v1081_v34 = vsel %vm401_vm5, %v4640_v32, 0.0  ;;  %v44_v54 = vld [vmem:[%s5145_s3 + $0x68] sm:$0xff] }
 0x6db   :  { %v4660_v39 = vpop.f32.mrf.mxu1 }
 0x6dd   :  { %v4061_v40 = vpop.f32.mrf.mxu1 }
 0x6e2   :  { %v4054_v41 = vpop.f32.mrf.mxu0 }
 0x6e4   :  { %v1037_v43 = vpop.f32.mrf.mxu0 }
 0x6e6   :  { %v4068_v44 = vpop.f32.mrf.mxu0 }
 0x6e7   :  { %4070 = vmatpush3.msra.mxu1 %v4068_v44 }
 0x6e8   :  { %v1232_v45 = vpop.f32.mrf.mxu0  ;;  %4071 = vmatprep.subr.mxu1 %v4398_v38 }
 0x6e9   :  { %4072 = vmatpush3.msra.mxu1 %v1232_v45 }
 0x6ea   :  { %4074 = vmatmul.mubr.msk.f32.vlgmr.msra.gmra.mxu1 %vm401_vm5, %v4628_v19  ;;  %4083 = vmatprep.subr.mxu1 %v4628_v19 }
 0x6eb   :  { %4084 = vmatpush3.msra.mxu1 %v4628_v19  ;;  %4085 = vmatprep.mubr.msk.f32.mxu1 %vm287_vm3, %v4616_v6 }
 0x6ec   :  { %4095 = vmatprep.subr.mxu1 %v41_v47 }
 0x6ee   :  { %4086 = vmatmul.mubr.msk.f32.vlgmr.msra.gmra.mxu1 %vm287_vm3, %v4604_v12 }
 0x6ef   :  { %4096 = vmatpush3.msra.mxu1 %v41_v47  ;;  %4103 = vmatprep.mubr.msk.f32.mxu1 %vm189_vm2, %v1037_v43 }
 0x6f0   :  { %4097 = vmatprep.subr.mxu1 %v40_v49 }
 0x6f1   :  { %4098 = vmatpush3.msra.mxu1 %v40_v49 }
 0x6f2   :  { %4099 = vmatprep.subr.mxu1 %v39_v50 }
 0x6f3   :  { %4100 = vmatpush3.msra.mxu1 %v39_v50 }
 0x6f4   :  { %4101 = vmatprep.subr.mxu1 %v38_v51 }
 0x6f5   :  { %4102 = vmatpush3.msra.mxu1 %v38_v51 }
 0x6f6   :  { %4104 = vmatmul.mubr.msk.f32.vlgmr.msra.gmra.mxu1 %vm189_vm2, %v4054_v41 }
 0x7aa   :  { %v4685_v53 = vpop.f32.mrf.mxu1 }
 0x7ac   :  { %v4075_v55 = vpop.f32.mrf.mxu1 }
 0x7ad   :  { %v43_v55 = vld [vmem:[%s5145_s3 + $0x60] sm:$0xff] }
 0x7ae   :  { %v4087_v56 = vpop.f32.mrf.mxu1 }
 0x7af   :  { %v1572_v58 = vmul.f32 2.0, %v4087_v56  ;;  %v42_v56 = vld [vmem:[%s5145_s3 + $0x58] sm:$0xff] }
 0x7b0   :  { %v1524_v61 = vpop.f32.mrf.mxu1 }
 0x7b1   :  { %v1574_v63 = vsub.f32 %v1570_v57, %v1572_v58  ;;  %v1571_v0 = vmul.f32 2.0, %v1524_v61  ;;  %v50_v58 = vld [vmem:[%s5145_s3 + $0x98] sm:$0xff]  ;;  %v49_v61 = vld [vmem:[%s5145_s3 + $0x90] sm:$0xff] }
 0x7b2   :  { %4123 = vmatprep.subr.mxu1 %v50_v58 }
 0x7b3   :  { %v1576_v1 = vmax.f32 %v1574_v63, 0.0  ;;  %v1573_v2 = vsub.f32 %v1569_v62, %v1571_v0  ;;  %4124 = vmatpush3.msra.mxu1 %v50_v58  ;;  %v3791_v0 = vld [vmem:[%s5145_s3 + $0x78] ss:$0 sm:$0xff] }
 0x7b4   :  { %4125 = vmatprep.subr.mxu1 %v49_v61 }
 0x7b5   :  { %4304 = vrsqrt.f32 %v1576_v1  ;;  %v1575_v59 = vmax.f32 %v1573_v2, 0.0  ;;  %vm1586_vm10 = vcmp.eq.f32.partialorder %v1576_v1, inf  ;;  %v1589_v8 = vand.u32 2147483648, %v1576_v1  ;;  %4126 = vmatpush3.msra.mxu1 %v49_v61 }
 0x7b6   :  { %vm1588_vm13 = vcmp.eq.f32.partialorder %v1576_v1, 0.0  ;;  %v4105_v62 = vpop.f32.mrf.mxu1 }
 0x7b7   :  { %4306 = vrsqrt.f32 %v1575_v59  ;;  %vm1579_vm11 = vcmp.eq.f32.partialorder %v1575_v59, inf  ;;  %v1582_v14 = vand.u32 2147483648, %v1575_v59  ;;  %vm1581_vm12 = vcmp.eq.f32.partialorder %v1575_v59, 0.0 }
 0x7b8   :  { %v1812_v2 = vadd.f32 %v4105_v62, %v3791_v0 }
 0x7c2   :  { %v4305_v3 = vpop.eup %4304 }
 0x7c3   :  { %v1585_v4 = vmul.f32 %v4305_v3, %v1576_v1 }
 0x7c4   :  { %v4307_v5 = vpop.eup %4306 }
 0x7c5   :  { %v1578_v7 = vmul.f32 %v4307_v5, %v1575_v59  ;;  %v1587_v48 = vsel %vm1586_vm10, %v1576_v1, %v1585_v4  ;;  %v1806_v1 = vpop.f32.mrf.mxu1 }
 0x7c6   :  { %v1590_v17 = vsel %vm1588_vm13, %v1589_v8, %v1587_v48  ;;  %v1807_v3 = vadd.f32 %v3791_v0, %v1806_v1  ;;  %vm2573_vm13 = vcmask 15360  }
 0x7c7   :  { %v1580_v15 = vsel %vm1579_vm11, %v1575_v59, %v1578_v7  ;;  %v1592_v27 = vmul.f32 %v1590_v17, %v4649_v33 }
 0x7c8   :  { %v1583_v16 = vsel %vm1581_vm12, %v1582_v14, %v1580_v15  ;;  %vm3729_vm12 = vcmask 41984  }
 0x7c9   :  { %v1591_v18 = vmul.f32 %v1583_v16, %v4640_v32  ;;  %v1596_v28 = vsel %vm401_vm5, %v1592_v27, 0.0 }
 0x7cb   :  { %v1593_v25 = vsel %vm401_vm5, %v1591_v18, 0.0 }
 0x7cc   :  { %1594 = vadd.xlane.f32.xlu0 %v1593_v25 }
 0x7d0   :  { %1597 = vadd.xlane.f32.xlu0 %v1596_v28 }
 0x7d4   :  { %1085 = vadd.xlane.f32.xlu0 %v1084_v29  ;;  %v3800_v29 = vld [vmem:[%s5145_s3 + $0xa0] ss:$0 sm:$0xff] }
 0x7d8   :  { %1082 = vadd.xlane.f32.xlu0 %v1081_v34 }
 0x855   :  { %v1595_v36 = vpop.xlane.xlu0 %1594 }
 0x856   :  { %v1599_v37 = vadd.f32 1e-15, %v1595_v36 }
 0x858   :  { %4308 = vrsqrt.f32 %v1599_v37 }
 0x859   :  { %v1598_v40 = vpop.xlane.xlu0 %1597 }
 0x85a   :  { %v1600_v41 = vadd.f32 1e-15, %v1598_v40 }
 0x85c   :  { %4310 = vrsqrt.f32 %v1600_v41 }
 0x85d   :  { %v1086_v43 = vpop.xlane.xlu0 %1085 }
 0x85e   :  { %v1312_v44 = vmul.f32 %v1086_v43, %v4604_v12  ;;  %v45_v12 = vld [vmem:[%s5145_s3 + $0x70] sm:$0xff] }
 0x860   :  { %4077 = vmatpush3.msra.mxu0 %v1312_v44 }
 0x861   :  { %v1083_v45 = vpop.xlane.xlu0 %1082  ;;  %4078 = vmatprep.subr.mxu0 %v4398_v38 }
 0x862   :  { %v1311_v33 = vmul.f32 %v1083_v45, %v4616_v6 }
 0x864   :  { %4079 = vmatpush3.msra.mxu0 %v1311_v33 }
 0x865   :  { %v4309_v47 = vpop.eup %4308  ;;  %4081 = vmatmul.mubr.msk.f32.vlgmr.msra.gmra.mxu0 %vm401_vm5, %v4628_v19  ;;  %4088 = vmatprep.subr.mxu0 %v4483_v24 }
 0x866   :  { %1605 = vxpose.xlu0.b32.start [1/2] (short) (narrow) %v4309_v47, 8  ;;  %4089 = vmatpush3.msra.mxu0 %v4483_v24  ;;  %v1603_v49 = vmul.f32 %v4309_v47, %v1591_v18 }
 0x867   :  { %4090 = vmatprep.subr.mxu0 %v4485_v26 }
 0x868   :  { %4091 = vmatpush3.msra.mxu0 %v4485_v26 }
 0x869   :  { %v4311_v32 = vpop.eup %4310  ;;  %4109 = vmatprep.subr.mxu0 %v45_v12 }
 0x86a   :  { %1606 = vxpose.xlu0.b32.end [2/2] (short) (narrow) %v4311_v32, 8  ;;  %v1604_v50 = vmul.f32 %v4311_v32, %v1592_v27 }
 0x8e2   :  { %v1621_v6 = vpop.trf.xlu0 }
 0x8e3   :  { %v1640_v19 = vrot.slane %v1621_v6, %v4576_v22 }
 0x8e5   :  { %v4709_v51 = vmul.f32 %v1640_v19, %v1603_v49  ;;  %v4711_v52 = vmul.f32 %v1640_v19, %v1604_v50 }
 0x8e7   :  { %4092 = vmatprep.mubr.msk.f32.mxu0 %vm401_vm5, %v4709_v51 }
 0x8e8   :  { %4093 = vmatmul.mubr.msk.f32.vlgmr.msra.gmra.mxu0 %vm401_vm5, %v4711_v52 }
 0x8e9   :  { %4110 = vmatpush3.msra.mxu0 %v45_v12  ;;  %4117 = vmatprep.mubr.msk.f32.mxu0 %vm189_vm2, %v4455_v10 }
 0x8ea   :  { %4111 = vmatprep.subr.mxu0 %v44_v54 }
 0x8eb   :  { %4112 = vmatpush3.msra.mxu0 %v44_v54 }
 0x8ec   :  { %4113 = vmatprep.subr.mxu0 %v43_v55 }
 0x8ed   :  { %4114 = vmatpush3.msra.mxu0 %v43_v55 }
 0x8ee   :  { %4115 = vmatprep.subr.mxu0 %v42_v56 }
 0x8ef   :  { %4116 = vmatpush3.msra.mxu0 %v42_v56 }
 0x8f0   :  { %4118 = vmatmul.mubr.msk.f32.vlgmr.msra.gmra.mxu0 %vm189_vm2, %v4457_v11  ;;  %v48_v11 = vld [vmem:[%s5145_s3 + $0x88] sm:$0xff] }
 0x8f1   :  { %4120 = vmatprep.mubr.msk.f32.mxu0 %vm189_vm2, %v4485_v26  ;;  %4127 = vmatprep.subr.mxu1 %v48_v11 }
 0x8f2   :  { %4128 = vmatpush3.msra.mxu1 %v48_v11 }
 0x8f4   :  { %4121 = vmatmul.mubr.msk.f32.gmra.mxu0 %vm189_vm2, %v4483_v24  ;;  %v47_v24 = vld [vmem:[%s5145_s3 + $0x80] sm:$0xff] }
 0x8f5   :  { %4129 = vmatprep.subr.mxu1 %v47_v24 }
 0x8f6   :  { %4130 = vmatpush3.msra.mxu1 %v47_v24 }
 0x925   :  { %v4734_v10 = vpop.f32.mrf.mxu0 }
 0x927   :  { %v4082_v57 = vpop.f32.mrf.mxu0 }
 0x9a8   :  { %v4094_v26 = vpop.f32.mrf.mxu0 }
 0x9aa   :  { %v1715_v63 = vpop.f32.mrf.mxu0 }
 0x9ab   :  { %4106 = vmatprep.mubr.msk.f32.mxu1 %vm189_vm2, %v1715_v63 }
 0x9ac   :  { %4107 = vmatmul.mubr.msk.f32.gmra.mxu1 %vm189_vm2, %v4094_v26 }
 0x9b0   :  { %v4119_v59 = vpop.f32.mrf.mxu0 }
 0x9b1   :  { %v1911_v4 = vadd.f32 %v4119_v59, %v1812_v2 }
 0x9b2   :  { %v1891_v5 = vpop.f32.mrf.mxu0 }
 0x9b3   :  { %v2096_v7 = vmul.f32 %v1911_v4, %v4502_v42  ;;  %v1910_v48 = vadd.f32 %v1891_v5, %v1807_v3 }
 0x9b4   :  { %v4122_v8 = vpop.f32.mrf.mxu0 }
 0x9b5   :  { %v2095_v14 = vmul.f32 %v1910_v48, %v4507_v46  ;;  %4131 = vmatprep.mubr.msk.f32.mxu1 %vm189_vm2, %v1910_v48  ;;  %4137 = vmatprep.subr.mxu0 %v2096_v7 }
 0x9b6   :  { %4132 = vmatmul.mubr.msk.f32.vlgmr.msra.gmra.mxu1 %vm189_vm2, %v1911_v4  ;;  %4138 = vmatpush3.msra.mxu0 %v2096_v7  ;;  %v1901_v25 = vpop.f32.mrf.mxu0 }
 0x9b7   :  { %4139 = vmatprep.subr.mxu0 %v2095_v14 }
 0x9b8   :  { %4140 = vmatpush3.msra.mxu0 %v2095_v14  ;;  %v2403_v14 = vsel %vm401_vm5, %v4636_v30, 0.0 }
 0xa6c   :  { %v4108_v15 = vpop.f32.mrf.mxu1 }
 0xa6d   :  { %v1822_v16 = vadd.f32 %v4108_v15, %v3791_v0 }
 0xa6e   :  { %v1816_v17 = vpop.f32.mrf.mxu1 }
 0xa6f   :  { %v1817_v18 = vadd.f32 %v3791_v0, %v1816_v17  ;;  %v4759_v28 = vadd.f32 %v4122_v8, %v1822_v16 }
 0xa71   :  { %v4757_v27 = vadd.f32 %v1901_v25, %v1817_v18 }
 0xa73   :  { %4134 = vmatprep.mubr.msk.f32.mxu1 %vm189_vm2, %v4757_v27 }
 0xa74   :  { %4135 = vmatmul.mubr.msk.f32.gmra.mxu1 %vm189_vm2, %v4759_v28 }
 0xa76   :  { %v4133_v34 = vpop.f32.mrf.mxu1 }
 0xa77   :  { %v2002_v36 = vadd.f32 %v4133_v34, %v3800_v29 }
 0xa78   :  { %v1996_v37 = vpop.f32.mrf.mxu1 }
 0xa79   :  { %v1997_v40 = vadd.f32 %v3800_v29, %v1996_v37  ;;  %v2018_v41 = vsel %vm401_vm5, %v2002_v36, -inf }
 0xa7a   :  { %2019 = vmax.xlane.f32.xlu0 %v2018_v41  ;;  %v2743_v41 = vmul.f32 %v4759_v28, %v4601_v9  ;;  %v4820_v28 = vadd.s32 8, %v4573_v21 }
 0xa7b   :  { %v2015_v43 = vsel %vm401_vm5, %v1997_v40, -inf }
 0xa7c   :  { %2016 = vmax.xlane.f32.xlu1 %v2015_v43  ;;  %v2742_v43 = vmul.f32 %v4757_v27, %v4612_v60 }
 0xb03   :  { %v2020_v44 = vpop.xlane.xlu0 %2019 }
 0xb04   :  { %v2028_v45 = vsub.f32 %v2002_v36, %v2020_v44 }
 0xb05   :  { %v2017_v33 = vpop.xlane.xlu1 %2016 }
 0xb06   :  { %v2027_v47 = vsub.f32 %v1997_v40, %v2017_v33  ;;  %v2033_v12 = vmul.f32 1.442695, %v2028_v45  ;;  %v4817_v33 = vand.u32 127, %v356_v20 }
 0xb08   :  { %v2031_v32 = vmul.f32 1.442695, %v2027_v47  ;;  %vm360_vm14 = vcmp.eq.s32.totalorder %v4573_v21, %v4817_v33  ;;  %vm362_vm15 = vcmp.eq.s32.totalorder %v4820_v28, %v4817_v33 }
 0xb0a   :  { %4312 = vpow2.f32 %v2031_v32 }
 0xb0b   :  { %4314 = vpow2.f32 %v2033_v12 }
 0xb17   :  { %v4313_v6 = vpop.eup %4312 }
 0xb18   :  { %v2039_v49 = vsel %vm401_vm5, %v4313_v6, 0.0  ;;  %v4315_v50 = vpop.eup %4314 }
 0xb19   :  { %2040 = vadd.xlane.f32.xlu1 %v2039_v49  ;;  %v2042_v19 = vsel %vm401_vm5, %v4315_v50, 0.0 }
 0xb1d   :  { %2043 = vadd.xlane.f32.xlu1 %v2042_v19 }
 0xb34   :  { %v4136_v54 = vpop.f32.mrf.mxu1 }
 0xb35   :  { %v4772_v55 = vadd.f32 %v4136_v54, %v3800_v29 }
 0xb36   :  { %v2006_v56 = vpop.f32.mrf.mxu1 }
 0xb37   :  { %v2007_v57 = vadd.f32 %v3800_v29, %v2006_v56  ;;  %v2024_v58 = vsel %vm401_vm5, %v4772_v55, -inf }
 0xb38   :  { %2025 = vmax.xlane.f32.xlu0 %v2024_v58 }
 0xb39   :  { %v2021_v61 = vsel %vm401_vm5, %v2007_v57, -inf }
 0xb3c   :  { %2022 = vmax.xlane.f32.xlu0 %v2021_v61 }
 0xba2   :  { %v2041_v11 = vpop.xlane.xlu1 %2040 }
 0xba3   :  { %4316 = vrcp.f32 %v2041_v11 }
 0xba6   :  { %v2044_v24 = vpop.xlane.xlu1 %2043 }
 0xba7   :  { %4318 = vrcp.f32 %v2044_v24 }
 0xbb0   :  { %v4317_v26 = vpop.eup %4316 }
 0xbb1   :  { %v2052_v62 = vmul.f32 %v4317_v26, %v4313_v6  ;;  %v3053_v26 = vsel %vm401_vm5, %v4711_v52, 0.0 }
 0xbb3   :  { %v2059_v63 = vmul.f32 %v2052_v62, %v4507_v46  ;;  %v2406_v46 = vsel %vm401_vm5, %v4638_v31, 0.0  ;;  %v3050_v62 = vsel %vm401_vm5, %v4709_v51, 0.0 }
 0xbb4   :  { %v4319_v0 = vpop.eup %4318 }
 0xbb5   :  { %v2054_v1 = vmul.f32 %v4319_v0, %v4315_v50  ;;  %2063 = vxpose.xlu1.b32.start [1/2] (short) (narrow) %v2059_v63, 16 }
 0xbb7   :  { %v2060_v2 = vmul.f32 %v2054_v1, %v4502_v42 }
 0xbb9   :  { %2064 = vxpose.xlu1.b32.end [2/2] (short) (narrow) %v2060_v2, 16  ;;  %4144 = vmatprep.subr.mxu0 %v2060_v2 }
 0xbc1   :  { %v4779_v59 = vpop.xlane.xlu0 %2025 }
 0xbc2   :  { %v2030_v44 = vsub.f32 %v4772_v55, %v4779_v59 }
 0xbc4   :  { %v2037_v45 = vmul.f32 1.442695, %v2030_v44 }
 0xbc5   :  { %v2023_v3 = vpop.xlane.xlu0 %2022 }
 0xbc6   :  { %v2029_v4 = vsub.f32 %v2007_v57, %v2023_v3 }
 0xbc8   :  { %v2035_v5 = vmul.f32 1.442695, %v2029_v4 }
 0xbca   :  { %4320 = vpow2.f32 %v2035_v5 }
 0xbd7   :  { %v4321_v7 = vpop.eup %4320 }
 0xbd8   :  { %v2045_v48 = vsel %vm401_vm5, %v4321_v7, 0.0 }
 0xbe0   :  { %2046 = vadd.xlane.f32.xlu1 %v2045_v48 }
 0xbe4   :  { %2407 = vadd.xlane.f32.xlu1 %v2406_v46 }
 0xbe8   :  { %2404 = vadd.xlane.f32.xlu1 %v2403_v14 }
 0xc31   :  { %v2079_v42 = vpop.trf.xlu1 }
 0xc32   :  { %4141 = vmatprep.mubr.msk.f32.mxu0 %vm401_vm5, %v2079_v42  ;;  %4155 = vmatprep.mubr.msk.f32.mxu1 %vm401_vm5, %v2079_v42 }
 0xc35   :  { %v2080_v8 = vpop.trf.xlu1 }
 0xc36   :  { %4142 = vmatmul.mubr.msk.f32.vlgmr.msra.gmra.mxu0 %vm401_vm5, %v2080_v8 }
 0xc37   :  { %4145 = vmatpush3.msra.mxu0 %v2060_v2  ;;  %4148 = vmatprep.mubr.msk.f32.mxu0 %vm401_vm5, %v4636_v30 }
 0xc38   :  { %4146 = vmatprep.subr.mxu0 %v2059_v63 }
 0xc39   :  { %4147 = vmatpush3.msra.mxu0 %v2059_v63 }
 0xc3a   :  { %4158 = vmatprep.subr.mxu0 %v2060_v2  ;;  %4149 = vmatmul.mubr.msk.f32.vlgmr.msra.gmra.mxu0 %vm401_vm5, %v4638_v31 }
 0xc3b   :  { %4159 = vmatpush3.msra.mxu0 %v2060_v2  ;;  %4162 = vmatprep.mubr.msk.f32.mxu0 %vm401_vm5, %v2079_v42 }
 0xc3c   :  { %4160 = vmatprep.subr.mxu0 %v2059_v63 }
 0xc3d   :  { %4161 = vmatpush3.msra.mxu0 %v2059_v63 }
 0xc3e   :  { %4163 = vmatmul.mubr.msk.f32.vlgmr.msra.gmra.mxu0 %vm401_vm5, %v2080_v8 }
 0xc69   :  { %v2047_v15 = vpop.xlane.xlu1 %2046 }
 0xc6a   :  { %4322 = vrcp.f32 %v2047_v15 }
 0xc6b   :  { %4324 = vpow2.f32 %v2037_v45 }
 0xc6d   :  { %v2408_v30 = vpop.xlane.xlu1 %2407 }
 0xc6e   :  { %v2410_v37 = vmul.f32 %v2408_v30, %v2060_v2  ;;  %v55_v30 = vld [vmem:[%s5145_s3 + $0xc0] sm:$0xff] }
 0xc71   :  { %v2405_v34 = vpop.xlane.xlu1 %2404 }
 0xc72   :  { %v2409_v40 = vmul.f32 %v2405_v34, %v2059_v63  ;;  %v1407_v34 = vmul.f32 %v4660_v39, %v4660_v39 }
 0xc77   :  { %v4323_v16 = vpop.eup %4322 }
 0xc78   :  { %v2056_v17 = vmul.f32 %v4323_v16, %v4321_v7  ;;  %v4325_v6 = vpop.eup %4324 }
 0xc79   :  { %v2048_v49 = vsel %vm401_vm5, %v4325_v6, 0.0 }
 0xc7a   :  { %v4796_v18 = vmul.f32 %v2056_v17, %v4612_v60 }
 0xc7c   :  { %2710 = vxpose.xlu1.b32.start [1/2] (short) (narrow) %v4796_v18, 16 }
 0xcf6   :  { %v4799_v25 = vpop.f32.mrf.mxu0 }
 0xcf7   :  { %4172 = vmatprep.subr.mxu0 %v4799_v25 }
 0xcf8   :  { %v4802_v31 = vpop.f32.mrf.mxu0  ;;  %4173 = vmatpush3.msra.mxu0 %v4799_v25 }
 0xcf9   :  { %4174 = vmatprep.subr.mxu0 %v4802_v31 }
 0xcfa   :  { %v4150_v29 = vpop.f32.mrf.mxu0  ;;  %4175 = vmatpush3.msra.mxu0 %v4802_v31 }
 0xcfb   :  { %4151 = vmatprep.subr.mxu1 %v4150_v29 }
 0xcfc   :  { %v2244_v36 = vpop.f32.mrf.mxu0  ;;  %4152 = vmatpush3.msra.mxu1 %v4150_v29 }
 0xcfd   :  { %4153 = vmatprep.subr.mxu1 %v2244_v36 }
 0xcfe   :  { %4154 = vmatpush3.msra.mxu1 %v2244_v36 }
 0xcff   :  { %4156 = vmatmul.mubr.msk.f32.vlgmr.msra.gmra.mxu1 %vm401_vm5, %v2080_v8  ;;  %4165 = vmatprep.subr.mxu1 %v2410_v37 }
 0xd00   :  { %4166 = vmatpush3.msra.mxu1 %v2410_v37  ;;  %4169 = vmatprep.mubr.msk.f32.mxu1 %vm401_vm5, %v2079_v42  ;;  %v53_v37 = vld [vmem:[%s5145_s3 + $0xb0] sm:$0xff] }
 0xd01   :  { %4167 = vmatprep.subr.mxu1 %v2409_v40 }
 0xd02   :  { %4168 = vmatpush3.msra.mxu1 %v2409_v40  ;;  %v52_v40 = vld [vmem:[%s5145_s3 + $0xa8] sm:$0xff] }
 0xd03   :  { %4170 = vmatmul.mubr.msk.f32.vlgmr.msra.gmra.mxu1 %vm401_vm5, %v2080_v8  ;;  %4179 = vmatprep.subr.mxu1 %v2743_v41 }
 0xd04   :  { %4180 = vmatpush3.msra.mxu1 %v2743_v41 }
 0xd05   :  { %4181 = vmatprep.subr.mxu1 %v2742_v43 }
 0xd06   :  { %4182 = vmatpush3.msra.mxu1 %v2742_v43  ;;  %v1408_v43 = vsel %vm287_vm3, %v1407_v34, 0.0 }
 0xdbf   :  { %v4822_v47 = vpop.f32.mrf.mxu1 }
 0xdc0   :  { %v2578_v12 = vsel %vm362_vm15, 0.0, %v4822_v47 }
 0xdc1   :  { %v4828_v60 = vpop.f32.mrf.mxu1  ;;  %v2582_v32 = vsel %vm401_vm5, %v2578_v12, 0.0 }
 0xdc2   :  { %v2577_v27 = vsel %vm360_vm14, 0.0, %v4828_v60 }
 0xdc3   :  { %v2579_v20 = vsel %vm401_vm5, %v2577_v27, 0.0 }
 0xdc4   :  { %2580 = vadd.xlane.f32.xlu0 %v2579_v20 }
 0xdc8   :  { %2583 = vadd.xlane.f32.xlu0 %v2582_v32  ;;  %v4171_v32 = vpop.f32.mrf.mxu1 }
 0xdcc   :  { %2049 = vadd.xlane.f32.xlu0 %v2048_v49 }
 0xe4d   :  { %v2581_v50 = vpop.xlane.xlu0 %2580 }
 0xe4e   :  { %v2585_v19 = vadd.f32 1e-15, %v2581_v50 }
 0xe50   :  { %4326 = vrsqrt.f32 %v2585_v19 }
 0xe51   :  { %v2584_v54 = vpop.xlane.xlu0 %2583 }
 0xe52   :  { %v2586_v55 = vadd.f32 1e-15, %v2584_v54 }
 0xe54   :  { %4328 = vrsqrt.f32 %v2586_v55 }
 0xe55   :  { %v2050_v56 = vpop.xlane.xlu0 %2049 }
 0xe56   :  { %4330 = vrcp.f32 %v2050_v56 }
 0xe5d   :  { %v4327_v57 = vpop.eup %4326 }
 0xe5e   :  { %2591 = vxpose.xlu0.b32.start [1/2] (short) (narrow) %v4327_v57, 8  ;;  %v2589_v0 = vmul.f32 %v4327_v57, %v2577_v27  ;;  %v728_v27 = vmul.f32 %v4556_v13, %v4556_v13 }
 0xe61   :  { %v4329_v58 = vpop.eup %4328 }
 0xe62   :  { %2592 = vxpose.xlu0.b32.end [2/2] (short) (narrow) %v4329_v58, 8  ;;  %v2590_v1 = vmul.f32 %v4329_v58, %v2578_v12  ;;  %v729_v12 = vsel %vm287_vm3, %v728_v27, 0.0  ;;  %v59_v27 = vld [vmem:[%s5145_s3 + $0xe0] sm:$0xff] }
 0xe63   :  { %v4331_v61 = vpop.eup %4330 }
 0xe64   :  { %v2058_v11 = vmul.f32 %v4331_v61, %v4325_v6  ;;  %v2477_v6 = vpop.f32.mrf.mxu1 }
 0xe66   :  { %v2062_v24 = vmul.f32 %v2058_v11, %v4601_v9 }
 0xe68   :  { %2711 = vxpose.xlu1.b32.end [2/2] (short) (narrow) %v2062_v24, 16  ;;  %4186 = vmatprep.subr.mxu0 %v2062_v24 }
 0xe8f   :  { %3054 = vadd.xlane.f32.xlu1 %v3053_v26 }
 0xe93   :  { %3051 = vadd.xlane.f32.xlu1 %v3050_v62 }
 0xeda   :  { %v2607_v63 = vpop.trf.xlu0 }
 0xedb   :  { %v2626_v2 = vrot.slane %v2607_v63, %v4576_v22 }
 0xedd   :  { %v2627_v59 = vmul.f32 %v2626_v2, %v2589_v0  ;;  %v2628_v3 = vmul.f32 %v2626_v2, %v2590_v1  ;;  %v4918_v1 = vsel %vm360_vm14, 1.0, %v4398_v38 }
 0xede   :  { %v4921_v2 = vmul.f32 0.35355338, %v4918_v1  ;;  %v1393_v33 = vmul.f32 %v4918_v1, %v4734_v10 }
 0xedf   :  { %4176 = vmatprep.mubr.msk.f32.mxu0 %vm401_vm5, %v2627_v59 }
 0xee0   :  { %4177 = vmatmul.mubr.msk.f32.vlgmr.msra.gmra.mxu0 %vm401_vm5, %v2628_v3  ;;  %v2726_v9 = vpop.trf.xlu1 }
 0xee1   :  { %4187 = vmatpush3.msra.mxu0 %v2062_v24  ;;  %4190 = vmatprep.mubr.msk.f32.mxu0 %vm401_vm5, %v4709_v51  ;;  %v4862_v51 = vpop.f32.mrf.mxu0 }
 0xee2   :  { %4188 = vmatprep.subr.mxu0 %v4796_v18  ;;  %4183 = vmatprep.mubr.msk.f32.mxu1 %vm401_vm5, %v2726_v9  ;;  %v2521_v44 = vmul.f32 %v4862_v51, %v4862_v51 }
 0xee3   :  { %4189 = vmatpush3.msra.mxu0 %v4796_v18  ;;  %v4864_v5 = vpop.f32.mrf.mxu0 }
 0xee4   :  { %4200 = vmatprep.subr.mxu0 %v2062_v24  ;;  %4191 = vmatmul.mubr.msk.f32.vlgmr.msra.gmra.mxu0 %vm401_vm5, %v4711_v52  ;;  %v2727_v4 = vpop.trf.xlu1  ;;  %v2520_v41 = vmul.f32 %v4864_v5, %v4864_v5  ;;  %v2525_v20 = vsel %vm401_vm5, %v2521_v44, 0.0 }
 0xee5   :  { %4201 = vmatpush3.msra.mxu0 %v2062_v24  ;;  %4204 = vmatprep.mubr.msk.f32.mxu0 %vm401_vm5, %v2726_v9 }
 0xee6   :  { %4202 = vmatprep.subr.mxu0 %v4796_v18  ;;  %4184 = vmatmul.mubr.msk.f32.vlgmr.msra.gmra.mxu1 %vm401_vm5, %v2727_v4  ;;  %v2522_v45 = vsel %vm401_vm5, %v2520_v41, 0.0 }
 0xee7   :  { %4203 = vmatpush3.msra.mxu0 %v4796_v18  ;;  %4197 = vmatprep.mubr.msk.f32.mxu1 %vm401_vm5, %v2726_v9 }
 0xee8   :  { %4205 = vmatmul.mubr.msk.f32.vlgmr.msra.gmra.mxu0 %vm401_vm5, %v2727_v4 }
 0xf18   :  { %v3055_v7 = vpop.xlane.xlu1 %3054 }
 0xf19   :  { %v3057_v8 = vmul.f32 %v3055_v7, %v2062_v24 }
 0xf1c   :  { %v3052_v14 = vpop.xlane.xlu1 %3051 }
 0xf1d   :  { %v3056_v16 = vmul.f32 %v3052_v14, %v4796_v18  ;;  %v54_v18 = vld [vmem:[%s5145_s3 + $0xb8] sm:$0xff] }
 0xfa0   :  { %v4178_v52 = vpop.f32.mrf.mxu0 }
 0xfa2   :  { %v2701_v48 = vpop.f32.mrf.mxu0 }
 0xfa4   :  { %v4192_v46 = vpop.f32.mrf.mxu0 }
 0xfa5   :  { %4193 = vmatprep.subr.mxu1 %v4192_v46 }
 0xfa6   :  { %v2891_v42 = vpop.f32.mrf.mxu0  ;;  %4194 = vmatpush3.msra.mxu1 %v4192_v46  ;;  %v4904_v49 = vpop.f32.mrf.mxu1 }
 0xfa7   :  { %4195 = vmatprep.subr.mxu1 %v2891_v42  ;;  %4214 = vmatprep.subr.mxu0 %v4904_v49 }
 0xfa8   :  { %4196 = vmatpush3.msra.mxu1 %v2891_v42  ;;  %v4866_v15 = vpop.f32.mrf.mxu0  ;;  %v4907_v50 = vpop.f32.mrf.mxu1  ;;  %4215 = vmatpush3.msra.mxu0 %v4904_v49 }
 0xfa9   :  { %4198 = vmatmul.mubr.msk.f32.vlgmr.msra.gmra.mxu1 %vm401_vm5, %v2727_v4  ;;  %4207 = vmatprep.subr.mxu1 %v3057_v8 }
 0xfaa   :  { %v4870_v17 = vpop.f32.mrf.mxu0  ;;  %4208 = vmatpush3.msra.mxu1 %v3057_v8  ;;  %4211 = vmatprep.mubr.msk.f32.mxu1 %vm401_vm5, %v2726_v9  ;;  %v4945_v8 = vsel %vm362_vm15, 1.0, %v4398_v38 }
 0xfab   :  { %v3167_v29 = vmul.f32 %v4870_v17, %v4870_v17  ;;  %4209 = vmatprep.subr.mxu1 %v3056_v16  ;;  %4216 = vmatprep.subr.mxu0 %v4907_v50  ;;  %v2502_v34 = vmul.f32 %v4171_v32, %v4945_v8 }
 0xfac   :  { %4210 = vmatpush3.msra.mxu1 %v3056_v16  ;;  %4217 = vmatpush3.msra.mxu0 %v4907_v50 }
 0xfad   :  { %4212 = vmatmul.mubr.msk.f32.vlgmr.msra.gmra.mxu1 %vm401_vm5, %v2727_v4  ;;  %4221 = vmatprep.subr.mxu1 %v55_v30  ;;  %v3169_v36 = vsel %vm401_vm5, %v3167_v29, 0.0  ;;  %v2501_v29 = vmul.f32 %v4918_v1, %v2477_v6  ;;  %v2506_v28 = vsel %vm401_vm5, %v2502_v34, 0.0 }
 0xfae   :  { %3170 = vadd.xlane.f32.xlu1 %v3169_v36  ;;  %4222 = vmatpush3.msra.mxu1 %v55_v30 }
 0xfaf   :  { %4229 = vmatprep.mubr.msk.f32.mxu1 %vm189_vm2, %v2701_v48  ;;  %4223 = vmatprep.subr.mxu1 %v54_v18  ;;  %v2503_v36 = vsel %vm401_vm5, %v2501_v29, 0.0 }
 0xfb0   :  { %4224 = vmatpush3.msra.mxu1 %v54_v18  ;;  %4235 = vmatprep.subr.mxu0 %v59_v27 }
 0xfb1   :  { %4225 = vmatprep.subr.mxu1 %v53_v37 }
 0xfb2   :  { %1409 = vadd.xlane.f32.xlu1 %v1408_v43  ;;  %4226 = vmatpush3.msra.mxu1 %v53_v37  ;;  %v1394_v37 = vsel %vm287_vm3, %v1393_v33, 0.0 }
 0xfb3   :  { %4227 = vmatprep.subr.mxu1 %v52_v40 }
 0xfb4   :  { %4228 = vmatpush3.msra.mxu1 %v52_v40 }
 0xfb5   :  { %4230 = vmatmul.mubr.msk.f32.vlgmr.msra.gmra.mxu1 %vm189_vm2, %v4178_v52  ;;  %4249 = vmatprep.subr.mxu1 %v4398_v38 }
 0xfb6   :  { %2523 = vadd.xlane.f32.xlu1 %v2522_v45 }
 0xfba   :  { %2526 = vadd.xlane.f32.xlu1 %v2525_v20  ;;  %v3168_v20 = vmul.f32 %v4866_v15, %v4866_v15 }
 0xfbe   :  { %730 = vadd.xlane.f32.xlu1 %v729_v12  ;;  %v3172_v12 = vsel %vm401_vm5, %v3168_v20, 0.0 }
0x1037   :  { %v4912_v19 = vpop.xlane.xlu1 %3170 }
0x103b   :  { %v1410_v54 = vpop.xlane.xlu1 %1409 }
0x103c   :  { %v1411_v55 = vrot.slane %v1410_v54, 4 }
0x103e   :  { %v1412_v56 = vadd.f32 %v1411_v55, %v1410_v54 }
0x1040   :  { %v1413_v57 = vrot.slane %v1412_v56, 2 }
0x1042   :  { %v1414_v58 = vadd.f32 %v1413_v57, %v1412_v56 }
0x1044   :  { %v1415_v61 = vrot.slane %v1414_v58, 1 }
0x1046   :  { %v1416_v11 = vadd.f32 %v1415_v61, %v1414_v58  ;;  %v58_v58 = vld [vmem:[%s5145_s3 + $0xd8] sm:$0xff]  ;;  %v57_v61 = vld [vmem:[%s5145_s3 + $0xd0] sm:$0xff] }
0x1048   :  { %4332 = vrsqrt.f32 %v1416_v11  ;;  %vm1419_vm0 = vcmp.eq.f32.partialorder %v1416_v11, inf  ;;  %v1422_v62 = vand.u32 2147483648, %v1416_v11  ;;  %vm1421_vm1 = vcmp.eq.f32.partialorder %v1416_v11, 0.0 }
0x1055   :  { %v4333_v24 = vpop.eup %4332 }
0x1056   :  { %v1418_v26 = vmul.f32 %v4333_v24, %v1416_v11 }
0x1058   :  { %v1420_v63 = vsel %vm1419_vm0, %v1416_v11, %v1418_v26  ;;  %vm2575_vm0 = vcmask 23552  }
0x1059   :  { %v1423_v0 = vsel %vm1421_vm1, %v1422_v62, %v1420_v63 }
0x105a   :  { %4334 = vrcp.f32 %v1423_v0 }
0x1067   :  { %v4335_v59 = vpop.eup %4334 }
0x1068   :  { %v1425_v3 = vmul.f32 %v4335_v59, %v4660_v39 }
0x1069   :  { %v4924_v9 = vpop.f32.mrf.mxu1 }
0x106a   :  { %v4927_v4 = vsub.f32 %v1425_v3, %v4921_v2  ;;  %v3220_v39 = vsel %vm362_vm15, 0.0, %v4924_v9 }
0x106b   :  { %v4929_v7 = vpop.f32.mrf.mxu1  ;;  %v3224_v21 = vsel %vm401_vm5, %v3220_v39, 0.0 }
0x106c   :  { %v3219_v52 = vsel %vm360_vm14, 0.0, %v4929_v7 }
0x106d   :  { %v4213_v48 = vpop.f32.mrf.mxu1  ;;  %v3221_v46 = vsel %vm401_vm5, %v3219_v52, 0.0 }
0x106e   :  { %3222 = vadd.xlane.f32.xlu0 %v3221_v46  ;;  %v3149_v16 = vmul.f32 %v4213_v48, %v4945_v8 }
0x106f   :  { %v3124_v14 = vpop.f32.mrf.mxu1 }
0x1070   :  { %v3148_v42 = vmul.f32 %v4918_v1, %v3124_v14  ;;  %v3153_v18 = vsel %vm401_vm5, %v3149_v16, 0.0 }
0x1072   :  { %3225 = vadd.xlane.f32.xlu0 %v3224_v21  ;;  %v3150_v30 = vsel %vm401_vm5, %v3148_v42, 0.0 }
0x1073   :  { %3151 = vadd.xlane.f32.xlu1 %v3150_v30 }
0x1077   :  { %3154 = vadd.xlane.f32.xlu1 %v3153_v18 }
0x107b   :  { %2504 = vadd.xlane.f32.xlu1 %v2503_v36 }
0x107f   :  { %2507 = vadd.xlane.f32.xlu1 %v2506_v28 }
0x1083   :  { %1395 = vadd.xlane.f32.xlu1 %v1394_v37 }
0x10f7   :  { %v3223_v40 = vpop.xlane.xlu0 %3222 }
0x10f8   :  { %v3227_v41 = vadd.f32 1e-15, %v3223_v40 }
0x10fa   :  { %4336 = vrsqrt.f32 %v3227_v41 }
0x10fb   :  { %v3226_v43 = vpop.xlane.xlu0 %3225 }
0x10fc   :  { %v3228_v44 = vadd.f32 1e-15, %v3226_v43 }
0x10fe   :  { %4338 = vrsqrt.f32 %v3228_v44 }
0x1107   :  { %v4337_v45 = vpop.eup %4336 }
0x1108   :  { %3233 = vxpose.xlu0.b32.start [1/2] (short) (narrow) %v4337_v45, 8  ;;  %v3231_v6 = vmul.f32 %v4337_v45, %v3219_v52 }
0x110b   :  { %v4339_v10 = vpop.eup %4338 }
0x110c   :  { %3234 = vxpose.xlu0.b32.end [2/2] (short) (narrow) %v4339_v10, 8  ;;  %v3232_v54 = vmul.f32 %v4339_v10, %v3220_v39 }
0x1139   :  { %3173 = vadd.xlane.f32.xlu0 %v3172_v12 }
0x1184   :  { %v3249_v32 = vpop.trf.xlu0 }
0x1185   :  { %v3268_v55 = vrot.slane %v3249_v32, %v4576_v22  ;;  %v56_v22 = vld [vmem:[%s5145_s3 + $0xc8] sm:$0xff] }
0x1187   :  { %v3269_v56 = vmul.f32 %v3268_v55, %v3231_v6  ;;  %v3270_v57 = vmul.f32 %v3268_v55, %v3232_v54 }
0x1189   :  { %4218 = vmatprep.mubr.msk.f32.mxu0 %vm401_vm5, %v3269_v56 }
0x118a   :  { %4219 = vmatmul.mubr.msk.f32.vlgmr.msra.gmra.mxu0 %vm401_vm5, %v3270_v57  ;;  %v2546_v57 = vmul.f32 0.25, %v4945_v8 }
0x118b   :  { %4236 = vmatpush3.msra.mxu0 %v59_v27  ;;  %4243 = vmatprep.mubr.msk.f32.mxu0 %vm189_vm2, %v4802_v31  ;;  %v2524_v31 = vpop.xlane.xlu1 %2523 }
0x118c   :  { %4237 = vmatprep.subr.mxu0 %v58_v58 }
0x118d   :  { %4238 = vmatpush3.msra.mxu0 %v58_v58 }
0x118e   :  { %4239 = vmatprep.subr.mxu0 %v57_v61 }
0x118f   :  { %4240 = vmatpush3.msra.mxu0 %v57_v61  ;;  %v2527_v11 = vpop.xlane.xlu1 %2526 }
0x1190   :  { %4241 = vmatprep.subr.mxu0 %v56_v22  ;;  %v2528_v26 = vadd.f32 %v2527_v11, %v2524_v31 }
0x1191   :  { %4242 = vmatpush3.msra.mxu0 %v56_v22 }
0x1192   :  { %4244 = vmatmul.mubr.msk.f32.vlgmr.msra.gmra.mxu0 %vm189_vm2, %v4799_v25  ;;  %4260 = vmatprep.subr.mxu0 %v4398_v38  ;;  %v2529_v63 = vrot.slane %v2528_v26, 4 }
0x1193   :  { %4246 = vmatprep.mubr.msk.f32.mxu0 %vm189_vm2, %v4907_v50  ;;  %v731_v24 = vpop.xlane.xlu1 %730 }
0x1194   :  { %v732_v62 = vrot.slane %v731_v24, 4  ;;  %v2530_v59 = vadd.f32 %v2529_v63, %v2528_v26 }
0x1196   :  { %4247 = vmatmul.mubr.msk.f32.gmra.mxu0 %vm189_vm2, %v4904_v49  ;;  %v733_v0 = vadd.f32 %v732_v62, %v731_v24  ;;  %v2531_v3 = vrot.slane %v2530_v59, 2 }
0x1197   :  { %4268 = vmatprep.mubr.msk.f32.mxu0 %vm4399_vm4, %v4398_v38 }
0x1198   :  { %v734_v25 = vrot.slane %v733_v0, 2  ;;  %v2532_v48 = vadd.f32 %v2531_v3, %v2530_v59  ;;  %v704_v59 = vmul.f32 %v4918_v1, %v4578_v23  ;;  %v63_v23 = vld [vmem:[%s5145_s3 + $0x100] sm:$0xff] }
0x119a   :  { %v735_v52 = vadd.f32 %v734_v25, %v733_v0  ;;  %v2533_v50 = vrot.slane %v2532_v48, 1  ;;  %v3134_v0 = vmul.f32 %v4924_v9, %v4945_v8  ;;  %v705_v3 = vsel %vm287_vm3, %v704_v59, 0.0 }
0x119c   :  { %v736_v46 = vrot.slane %v735_v52, 1  ;;  %v2534_v42 = vadd.f32 %v2533_v50, %v2532_v48  ;;  %v62_v48 = vld [vmem:[%s5145_s3 + $0xf8] sm:$0xff]  ;;  %v69_v50 = vld [vmem:[%s5145_s3 + $0x130] sm:$0xff] }
0x119d   :  { %4261 = vmatpush3.msra.mxu0 %v69_v50 }
0x119e   :  { %v737_v39 = vadd.f32 %v736_v46, %v735_v52  ;;  %vm2537_vm8 = vcmp.eq.f32.partialorder %v2534_v42, inf  ;;  %v2540_v44 = vand.u32 2147483648, %v2534_v42  ;;  %vm2539_vm9 = vcmp.eq.f32.partialorder %v2534_v42, 0.0  ;;  %v61_v46 = vld [vmem:[%s5145_s3 + $0xf0] sm:$0xff]  ;;  %4262 = vmatprep.subr.mxu0 %v4398_v38 }
0x11a0   :  { %4340 = vrsqrt.f32 %v737_v39  ;;  %vm740_vm6 = vcmp.eq.f32.partialorder %v737_v39, inf  ;;  %v743_v41 = vand.u32 2147483648, %v737_v39  ;;  %vm742_vm7 = vcmp.eq.f32.partialorder %v737_v39, 0.0 }
0x11a1   :  { %4342 = vrsqrt.f32 %v2534_v42 }
0x11ad   :  { %v4341_v36 = vpop.eup %4340 }
0x11ae   :  { %v4343_v33 = vpop.eup %4342  ;;  %v739_v28 = vmul.f32 %v4341_v36, %v737_v39 }
0x11af   :  { %v2536_v37 = vmul.f32 %v4343_v33, %v2534_v42 }
0x11b0   :  { %v741_v40 = vsel %vm740_vm6, %v737_v39, %v739_v28  ;;  %v4231_v39 = vpop.f32.mrf.mxu1 }
0x11b1   :  { %v2538_v43 = vsel %vm2537_vm8, %v2534_v42, %v2536_v37  ;;  %v3829_v42 = vld [vmem:[%s5145_s3 + $0xe8] ss:$0 sm:$0xff] }
0x11b2   :  { %v2541_v10 = vsel %vm2539_vm9, %v2540_v44, %v2538_v43  ;;  %vm3750_vm9 = vcmask 48128  }
0x11c2   :  { %v3174_v14 = vpop.xlane.xlu0 %3173 }
0x11c3   :  { %v3175_v49 = vadd.f32 %v3174_v14, %v4912_v19  ;;  %v744_v19 = vsel %vm742_vm7, %v743_v41, %v741_v40 }
0x11c5   :  { %v3176_v21 = vrot.slane %v3175_v49, 4 }
0x11c7   :  { %v3177_v16 = vadd.f32 %v3176_v21, %v3175_v49  ;;  %v3434_v49 = vpop.f32.mrf.mxu1 }
0x11c9   :  { %v3178_v30 = vrot.slane %v3177_v16, 2 }
0x11cb   :  { %v3179_v29 = vadd.f32 %v3178_v30, %v3177_v16  ;;  %v3435_v16 = vadd.f32 %v3829_v42, %v3434_v49  ;;  %v3440_v30 = vadd.f32 %v4231_v39, %v3829_v42 }
0x11cd   :  { %v3180_v18 = vrot.slane %v3179_v29, 1 }
0x11cf   :  { %v3181_v34 = vadd.f32 %v3180_v18, %v3179_v29 }
0x11d1   :  { %4344 = vrsqrt.f32 %v3181_v34  ;;  %vm3184_vm10 = vcmp.eq.f32.partialorder %v3181_v34, inf  ;;  %v3187_v20 = vand.u32 2147483648, %v3181_v34  ;;  %vm3186_vm11 = vcmp.eq.f32.partialorder %v3181_v34, 0.0 }
0x11d2   :  { %4346 = vrcp.f32 %v744_v19 }
0x11d3   :  { %4348 = vrcp.f32 %v2541_v10 }
0x11de   :  { %v4345_v45 = vpop.eup %4344 }
0x11df   :  { %v3183_v27 = vmul.f32 %v4345_v45, %v3181_v34  ;;  %v4347_v6 = vpop.eup %4346 }
0x11e0   :  { %v4988_v54 = vpop.eup %4348  ;;  %v746_v55 = vmul.f32 %v4347_v6, %v4556_v13 }
0x11e1   :  { %v3185_v12 = vsel %vm3184_vm10, %v3181_v34, %v3183_v27  ;;  %v2544_v31 = vmul.f32 %v4988_v54, %v4862_v51  ;;  %v3138_v51 = vsel %vm401_vm5, %v3134_v0, 0.0  ;;  %v66_v0 = vld [vmem:[%s5145_s3 + $0x118] sm:$0xff]  ;;  %v2543_v49 = vmul.f32 %v4988_v54, %v4864_v5 }
0x11e2   :  { %v3188_v32 = vsel %vm3186_vm11, %v3187_v20, %v3185_v12  ;;  %v748_v22 = vsub.f32 %v746_v55, %v4921_v2  ;;  %v2486_v2 = vmul.f32 %v4918_v1, %v4828_v60  ;;  %v64_v60 = vld [vmem:[%s5145_s3 + $0x108] sm:$0xff]  ;;  %v1383_v5 = vmul.f32 %v4918_v1, %v4685_v53 }
0x11e3   :  { %4350 = vrcp.f32 %v3188_v32  ;;  %v2548_v62 = vsub.f32 %v2544_v31, %v2546_v57  ;;  %4250 = vmatpush3.msra.mxu1 %v64_v60  ;;  %v2545_v60 = vmul.f32 0.25, %v4918_v1  ;;  %vm3752_vm10 = vcmask 80896  }
0x11e4   :  { %v749_v26 = vmul.f32 %v748_v22, %v748_v22  ;;  %v2488_v25 = vsel %vm401_vm5, %v2486_v2, 0.0  ;;  %4251 = vmatprep.subr.mxu1 %v4398_v38 }
0x11e5   :  { %v2550_v63 = vmul.f32 %v2548_v62, %v2548_v62  ;;  %4252 = vmatpush3.msra.mxu1 %v63_v23 }
0x11e6   :  { %v750_v13 = vsel %vm287_vm3, %v749_v26, 0.0  ;;  %4253 = vmatprep.subr.mxu1 %v4398_v38 }
0x11e7   :  { %4254 = vmatpush3.msra.mxu1 %v62_v48 }
0x11e8   :  { %4255 = vmatprep.subr.mxu1 %v4398_v38 }
0x11e9   :  { %4256 = vmatpush3.msra.mxu1 %v61_v46  ;;  %v1427_v46 = vmul.f32 %v4927_v4, %v4927_v4  ;;  %v3133_v4 = vmul.f32 %v4918_v1, %v4929_v7 }
0x11eb   :  { %v1428_v39 = vsel %vm287_vm3, %v1427_v46, 0.0  ;;  %v3135_v54 = vsel %vm401_vm5, %v3133_v4, 0.0 }
0x11f0   :  { %v4991_v56 = vpop.eup %4350 }
0x11f1   :  { %v3191_v58 = vmul.f32 %v4991_v56, %v4866_v15  ;;  %v2554_v15 = vsel %vm401_vm5, %v2550_v63, 0.0  ;;  %v67_v63 = vld [vmem:[%s5145_s3 + $0x120] sm:$0xff] }
0x11f3   :  { %v3193_v61 = vsub.f32 %v3191_v58, %v2546_v57 }
0x11f5   :  { %v3195_v11 = vmul.f32 %v3193_v61, %v3193_v61 }
0x11f7   :  { %v3199_v24 = vsel %vm401_vm5, %v3195_v11, 0.0 }
0x11f8   :  { %3200 = vadd.xlane.f32.xlu0 %v3199_v24 }
0x11fc   :  { %751 = vadd.xlane.f32.xlu0 %v750_v13  ;;  %v68_v13 = vld [vmem:[%s5145_s3 + $0x128] sm:$0xff] }
0x11fd   :  { %4263 = vmatpush3.msra.mxu0 %v68_v13 }
0x11fe   :  { %4264 = vmatprep.subr.mxu0 %v4398_v38 }
0x11ff   :  { %4265 = vmatpush3.msra.mxu0 %v67_v63 }
0x1200   :  { %2555 = vadd.xlane.f32.xlu0 %v2554_v15  ;;  %4266 = vmatprep.subr.mxu0 %v4398_v38  ;;  %v3838_v15 = vld [vmem:[%s5145_s3 + $0x110] ss:$0 sm:$0xff] }
0x1201   :  { %4267 = vmatpush3.msra.mxu0 %v66_v0 }
0x1204   :  { %3139 = vadd.xlane.f32.xlu0 %v3138_v51 }
0x1208   :  { %2489 = vadd.xlane.f32.xlu0 %v2488_v25 }
0x120c   :  { %706 = vadd.xlane.f32.xlu0 %v705_v3  ;;  %v3840_v3 = vld [vmem:[%s5145_s3 + $0x138] ss:$0 sm:$0xff]  ;;  %s4400_s3 = smov 6  }
0x124a   :  { %v4220_v52 = vpop.f32.mrf.mxu0 }
0x124c   :  { %v3343_v9 = vpop.f32.mrf.mxu0 }
0x124d   :  { %4232 = vmatprep.mubr.msk.f32.mxu1 %vm189_vm2, %v3343_v9 }
0x124e   :  { %4233 = vmatmul.mubr.msk.f32.gmra.mxu1 %vm189_vm2, %v4220_v52  ;;  %v3190_v52 = vmul.f32 %v4991_v56, %v4870_v17  ;;  %v714_v17 = vmul.f32 %v4918_v1, %v4658_v35  ;;  %v2487_v35 = vmul.f32 %v4822_v47, %v4945_v8 }
0x124f   :  { %4257 = vmatprep.mubr.msk.f32.mxu1 %vm4399_vm4, %v4398_v38  ;;  %vm3572_vm4 = vcmask 1040384  }
0x1250   :  { %v3192_v50 = vsub.f32 %v3190_v52, %v2545_v60 }
0x1252   :  { %v4245_v14 = vpop.f32.mrf.mxu0 }
0x1253   :  { %v3551_v18 = vadd.f32 %v4245_v14, %v3440_v30  ;;  %v3194_v14 = vmul.f32 %v3192_v50, %v3192_v50 }
0x1254   :  { %v3531_v21 = vpop.f32.mrf.mxu0 }
0x1255   :  { %v3550_v29 = vadd.f32 %v3531_v21, %v3435_v16  ;;  %v3555_v36 = vsel %vm189_vm2, %v3551_v18, 0.0  ;;  %v3196_v56 = vsel %vm401_vm5, %v3194_v14, 0.0  ;;  %v715_v21 = vsel %vm287_vm3, %v714_v17, 0.0 }
0x1256   :  { %v4248_v37 = vpop.f32.mrf.mxu0  ;;  %v2491_v18 = vsel %vm401_vm5, %v2487_v35, 0.0 }
0x1257   :  { %v3554_v34 = vsel %vm189_vm2, %v3550_v29, 0.0  ;;  %v1384_v29 = vsel %vm287_vm3, %v1383_v5, 0.0 }
0x1258   :  { %v3556_v33 = vadd.f32 %v3555_v36, %v3554_v34  ;;  %v3541_v27 = vpop.f32.mrf.mxu0  ;;  %v3152_v34 = vpop.xlane.xlu1 %3151 }
0x125a   :  { %v3557_v28 = vrot.slane %v3556_v33, 4 }
0x125c   :  { %v3558_v45 = vadd.f32 %v3557_v28, %v3556_v33  ;;  %v3155_v7 = vpop.xlane.xlu1 %3154 }
0x125e   :  { %v3559_v32 = vrot.slane %v3558_v45, 2 }
0x1260   :  { %v3560_v57 = vadd.f32 %v3559_v32, %v3558_v45  ;;  %v2505_v36 = vpop.xlane.xlu1 %2504 }
0x1262   :  { %v3561_v22 = vrot.slane %v3560_v57, 1 }
0x1264   :  { %v3562_v24 = vadd.f32 %v3561_v22, %v3560_v57  ;;  %v2508_v28 = vpop.xlane.xlu1 %2507 }
0x1281   :  { %v3201_v33 = vpop.xlane.xlu0 %3200 }
0x130e   :  { %v4234_v40 = vpop.f32.mrf.mxu1 }
0x130f   :  { %v3450_v41 = vadd.f32 %v4234_v40, %v3829_v42  ;;  %v752_v40 = vpop.xlane.xlu0 %751 }
0x1310   :  { %v3444_v19 = vpop.f32.mrf.mxu1  ;;  %v753_v53 = vrot.slane %v752_v40, 4 }
0x1311   :  { %v3553_v43 = vadd.f32 %v4248_v37, %v3450_v41  ;;  %v3445_v44 = vadd.f32 %v3829_v42, %v3444_v19  ;;  %v2547_v42 = vsub.f32 %v2543_v49, %v2545_v60  ;;  %v3156_v37 = vadd.f32 %v3155_v7, %v3152_v34  ;;  %v1396_v41 = vpop.xlane.xlu1 %1395 }
0x1312   :  { %v2509_v19 = vadd.f32 %v2508_v28, %v2505_v36  ;;  %v1397_v8 = vrot.slane %v1396_v41, 4 }
0x1313   :  { %v3552_v10 = vadd.f32 %v3541_v27, %v3445_v44  ;;  %v3564_v20 = vsel %vm189_vm2, %v3553_v43, 0.0  ;;  %v2549_v16 = vmul.f32 %v2547_v42, %v2547_v42  ;;  %v3157_v1 = vrot.slane %v3156_v37, 4  ;;  %v2556_v44 = vpop.xlane.xlu0 %2555 }
0x1314   :  { %v754_v43 = vadd.f32 %v753_v53, %v752_v40  ;;  %v2510_v45 = vrot.slane %v2509_v19, 4  ;;  %v1398_v32 = vadd.f32 %v1397_v8, %v1396_v41 }
0x1315   :  { %v3563_v12 = vsel %vm189_vm2, %v3552_v10, 0.0  ;;  %v2551_v30 = vsel %vm401_vm5, %v2549_v16, 0.0  ;;  %v3158_v47 = vadd.f32 %v3157_v1, %v3156_v37  ;;  %vm2571_vm5 = vcmask 7168  }
0x1316   :  { %v3565_v6 = vadd.f32 %v3564_v20, %v3563_v12  ;;  %v755_v10 = vrot.slane %v754_v43, 2  ;;  %v2511_v57 = vadd.f32 %v2510_v45, %v2509_v19 }
0x1317   :  { %v3159_v12 = vrot.slane %v3158_v47, 2 }
0x1318   :  { %v3566_v55 = vrot.slane %v3565_v6, 4 }
0x131a   :  { %v3567_v58 = vadd.f32 %v3566_v55, %v3565_v6  ;;  %v3140_v6 = vpop.xlane.xlu0 %3139 }
0x131c   :  { %v3568_v61 = vrot.slane %v3567_v58, 2 }
0x131e   :  { %v3569_v31 = vadd.f32 %v3568_v61, %v3567_v58  ;;  %v756_v61 = vadd.f32 %v755_v10, %v754_v43  ;;  %v5087_v63 = vpop.xlane.xlu0 %2489 }
0x1320   :  { %v3570_v11 = vrot.slane %v3569_v31, 1  ;;  %v757_v13 = vrot.slane %v756_v61, 1 }
0x1322   :  { %v3571_v26 = vadd.f32 %v3570_v11, %v3569_v31  ;;  %v3160_v31 = vadd.f32 %v3159_v12, %v3158_v47  ;;  %v1399_v11 = vrot.slane %v1398_v32, 2  ;;  %v707_v50 = vpop.xlane.xlu0 %706 }
0x1324   :  { %v3573_v62 = vsel %vm3572_vm4, %v3562_v24, %v3571_v26  ;;  %v2512_v26 = vrot.slane %v2511_v57, 2 }
0x1325   :  { %4258 = vmatmul.mubr.msk.f32.vlgmr.msra.gmra.mxu1 %vm189_vm2, %v3573_v62 }
0x13e5   :  { %v3647_v2 = vpop.f32.mrf.mxu1 }
0x13e6   :  { %v3648_v51 = vadd.f32 %v3838_v15, %v3647_v2  ;;  %v3161_v2 = vrot.slane %v3160_v31, 1 }
0x13e7   :  { %v4259_v59 = vpop.f32.mrf.mxu1 }
0x13e8   :  { %v3651_v25 = vmax.f32 %v3648_v51, 0.0  ;;  %v1400_v51 = vadd.f32 %v1399_v11, %v1398_v32 }
0x13ea   :  { %4269 = vmatmul.mubr.msk.f32.vlgmr.msra.gmra.mxu0 %vm189_vm2, %v3651_v25  ;;  %v1401_v46 = vrot.slane %v1400_v51, 1 }
0x13ec   :  { %v5094_v5 = vadd.f32 %v1401_v46, %v1400_v51 }
0x13ee   :  { %v1404_v53 = vadd.f32 1e-15, %v5094_v5 }
0x14aa   :  { %v3725_v9 = vpop.f32.mrf.mxu0 }
0x14ab   :  { %v3726_v38 = vadd.f32 %v3840_v3, %v3725_v9  ;;  %v2513_v3 = vadd.f32 %v2512_v26, %v2511_v57  ;;  %v5089_v9 = vadd.f32 %v757_v13, %v756_v61 }
0x14ac   :  { %v4270_v23 = vpop.f32.mrf.mxu0 }
0x14ad   :  { %v3730_v48 = vsel %vm3729_vm12, %v3726_v38, -inf  ;;  %v2514_v17 = vrot.slane %v2513_v3, 1  ;;  %vm761_vm2 = vcmp.eq.f32.partialorder %v5089_v9, inf  ;;  %vm763_vm6 = vcmp.eq.f32.partialorder %v5089_v9, 0.0 }
0x14ae   :  { %3731 = vmax.xlane.f32.xlu1 %v3730_v48  ;;  %v3162_v48 = vadd.f32 %v3161_v2, %v3160_v31 }
0x14af   :  { %v2515_v7 = vadd.f32 %v2514_v17, %v2513_v3 }
0x14b1   :  { %v2516_v47 = vadd.f32 1e-15, %v2515_v7 }
0x14b2   :  { %1429 = vadd.xlane.f32.xlu1 %v1428_v39 }
0x14b6   :  { %3197 = vadd.xlane.f32.xlu1 %v3196_v56 }
0x14ba   :  { %716 = vadd.xlane.f32.xlu1 %v715_v21 }
0x14be   :  { %2552 = vadd.xlane.f32.xlu1 %v2551_v30  ;;  %v3163_v30 = vadd.f32 1e-15, %v3162_v48 }
0x14c2   :  { %3136 = vadd.xlane.f32.xlu1 %v3135_v54  ;;  %v708_v54 = vrot.slane %v707_v50, 4 }
0x14c4   :  { %v709_v1 = vadd.f32 %v708_v54, %v707_v50 }
0x14c6   :  { %1385 = vadd.xlane.f32.xlu1 %v1384_v29  ;;  %v710_v10 = vrot.slane %v709_v1, 2 }
0x14c8   :  { %v711_v11 = vadd.f32 %v710_v10, %v709_v1 }
0x14ca   :  { %2492 = vadd.xlane.f32.xlu1 %v2491_v18  ;;  %v712_v51 = vrot.slane %v711_v11, 1 }
0x14cc   :  { %v713_v50 = vadd.f32 %v712_v51, %v711_v11 }
0x1537   :  { %v3732_v27 = vpop.xlane.xlu1 %3731 }
0x1538   :  { %v5084_v20 = vsub.f32 %v3726_v38, %v3732_v27 }
0x153a   :  { %v3734_v55 = vmul.f32 1.442695, %v5084_v20 }
0x153b   :  { %v1430_v58 = vpop.xlane.xlu1 %1429 }
0x153c   :  { %4352 = vpow2.f32 %v3734_v55  ;;  %v1431_v22 = vrot.slane %v1430_v58, 4 }
0x153d   :  { %4354 = vrsqrt.f32 %v5089_v9 }
0x153e   :  { %v1432_v24 = vadd.f32 %v1431_v22, %v1430_v58 }
0x153f   :  { %v3198_v62 = vpop.xlane.xlu1 %3197 }
0x1540   :  { %v1433_v0 = vrot.slane %v1432_v24, 2  ;;  %v3202_v15 = vadd.f32 %v3201_v33, %v3198_v62 }
0x1542   :  { %v1434_v59 = vadd.f32 %v1433_v0, %v1432_v24  ;;  %v3203_v25 = vrot.slane %v3202_v15, 4 }
0x1543   :  { %v717_v52 = vpop.xlane.xlu1 %716 }
0x1544   :  { %v1435_v38 = vrot.slane %v1434_v59, 1  ;;  %v3204_v60 = vadd.f32 %v3203_v25, %v3202_v15  ;;  %v718_v23 = vrot.slane %v717_v52, 4 }
0x1546   :  { %v5091_v39 = vadd.f32 %v1435_v38, %v1434_v59  ;;  %v3205_v14 = vrot.slane %v3204_v60, 2  ;;  %v719_v49 = vadd.f32 %v718_v23, %v717_v52 }
0x1547   :  { %v2553_v56 = vpop.xlane.xlu1 %2552 }
0x1548   :  { %v3206_v42 = vadd.f32 %v3205_v14, %v3204_v60  ;;  %v720_v21 = vrot.slane %v719_v49, 2  ;;  %v2557_v16 = vadd.f32 %v2556_v44, %v2553_v56  ;;  %4356 = vrsqrt.f32 %v5091_v39 }
0x1549   :  { %v4353_v4 = vpop.eup %4352  ;;  %4358 = vrcp.f32 %v3163_v30  ;;  %vm1439_vm3 = vcmp.eq.f32.partialorder %v5091_v39, inf  ;;  %vm1441_vm14 = vcmp.eq.f32.partialorder %v5091_v39, 0.0 }
0x154a   :  { %v3207_v35 = vrot.slane %v3206_v42, 1  ;;  %v721_v29 = vadd.f32 %v720_v21, %v719_v49  ;;  %v2558_v18 = vrot.slane %v2557_v16, 4  ;;  %v3736_v34 = vsel %vm3729_vm12, %v4353_v4, 0.0  ;;  %v4355_v31 = vpop.eup %4354 }
0x154b   :  { %3737 = vadd.xlane.f32.xlu1 %v3736_v34  ;;  %v3137_v36 = vpop.xlane.xlu1 %3136  ;;  %v760_v25 = vmul.f32 %v4355_v31, %v5089_v9  ;;  %v1442_v21 = vand.u32 2147483648, %v5091_v39 }
0x154c   :  { %v5098_v33 = vadd.f32 %v3207_v35, %v3206_v42  ;;  %v722_v28 = vrot.slane %v721_v29, 1  ;;  %v2559_v37 = vadd.f32 %v2558_v18, %v2557_v16  ;;  %v3141_v40 = vadd.f32 %v3140_v6, %v3137_v36 }
0x154d   :  { %v762_v49 = vsel %vm761_vm2, %v5089_v9, %v760_v25 }
0x154e   :  { %4360 = vrsqrt.f32 %v5098_v33  ;;  %v5102_v41 = vadd.f32 %v722_v28, %v721_v29  ;;  %v2560_v19 = vrot.slane %v2559_v37, 2  ;;  %v3142_v43 = vrot.slane %v3141_v40, 4 }
0x154f   :  { %v1386_v44 = vpop.xlane.xlu1 %1385  ;;  %4362 = vrcp.f32 %v1404_v53  ;;  %vm3211_vm15 = vcmp.eq.f32.partialorder %v5098_v33, inf  ;;  %v3214_v7 = vand.u32 2147483648, %v5098_v33  ;;  %vm3213_vm1 = vcmp.eq.f32.partialorder %v5098_v33, 0.0 }
0x1550   :  { %v725_v8 = vadd.f32 1e-15, %v5102_v41  ;;  %v2561_v45 = vadd.f32 %v2560_v19, %v2559_v37  ;;  %v3143_v27 = vadd.f32 %v3142_v43, %v3141_v40  ;;  %v1387_v12 = vrot.slane %v1386_v44, 4 }
0x1551   :  { %v724_v4 = vsub.f32 %v5102_v41, %v713_v50  ;;  %v764_v37 = vand.u32 2147483648, %v5089_v9 }
0x1552   :  { %4364 = vrcp.f32 %v725_v8  ;;  %v2562_v32 = vrot.slane %v2561_v45, 1  ;;  %v3144_v6 = vrot.slane %v3143_v27, 2  ;;  %v1388_v55 = vadd.f32 %v1387_v12, %v1386_v44 }
0x1553   :  { %v2493_v57 = vpop.xlane.xlu1 %2492  ;;  %4366 = vrcp.f32 %v2516_v47  ;;  %v765_v41 = vsel %vm763_vm6, %v764_v37, %v762_v49 }
0x1554   :  { %v5105_v58 = vadd.f32 %v2562_v32, %v2561_v45  ;;  %v3145_v61 = vadd.f32 %v3144_v6, %v3143_v27  ;;  %v2494_v22 = vadd.f32 %v2493_v57, %v5087_v63  ;;  %v1389_v24 = vrot.slane %v1388_v55, 2 }
0x1555   :  { %v4357_v26 = vpop.eup %4356 }
0x1556   :  { %4368 = vrsqrt.f32 %v5105_v58  ;;  %v3146_v62 = vrot.slane %v3145_v61, 1  ;;  %v2495_v13 = vrot.slane %v2494_v22, 4  ;;  %v1390_v0 = vadd.f32 %v1389_v24, %v1388_v55  ;;  %v4359_v52 = vpop.eup %4358 }
0x1557   :  { %v1438_v3 = vmul.f32 %v4357_v26, %v5091_v39  ;;  %vm2566_vm7 = vcmp.eq.f32.partialorder %v5105_v58, inf  ;;  %v2569_v44 = vand.u32 2147483648, %v5105_v58  ;;  %vm2568_vm8 = vcmp.eq.f32.partialorder %v5105_v58, 0.0 }
0x1558   :  { %v3147_v15 = vadd.f32 %v3146_v62, %v3145_v61  ;;  %v2496_v2 = vadd.f32 %v2495_v13, %v2494_v22  ;;  %v1391_v59 = vrot.slane %v1390_v0, 1 }
0x1559   :  { %v1440_v17 = vsel %vm1439_vm3, %v5091_v39, %v1438_v3 }
0x155a   :  { %v2497_v38 = vrot.slane %v2496_v2, 2  ;;  %v1392_v60 = vadd.f32 %v1391_v59, %v1390_v0  ;;  %v3165_v23 = vmul.f32 %v4359_v52, %v3147_v15  ;;  %v1443_v35 = vsel %vm1441_vm14, %v1442_v21, %v1440_v17 }
0x155b   :  { %v4361_v63 = vpop.eup %4360 }
0x155c   :  { %v2498_v48 = vadd.f32 %v2497_v38, %v2496_v2  ;;  %v3210_v46 = vmul.f32 %v4361_v63, %v5098_v33  ;;  %v1403_v14 = vsub.f32 %v5094_v5, %v1392_v60  ;;  %v4363_v56 = vpop.eup %4362  ;;  %v3166_v54 = vsub.f32 0.0, %v3165_v23 }
0x155e   :  { %v2499_v42 = vrot.slane %v2498_v48, 1  ;;  %v1406_v30 = vmul.f32 %v4363_v56, %v1403_v14  ;;  %v3212_v29 = vsel %vm3211_vm15, %v5098_v33, %v3210_v46 }
0x155f   :  { %v4365_v16 = vpop.eup %4364  ;;  %v3215_v53 = vsel %vm3213_vm1, %v3214_v7, %v3212_v29 }
0x1560   :  { %v2500_v5 = vadd.f32 %v2499_v42, %v2498_v48  ;;  %v4367_v18 = vpop.eup %4366  ;;  %v727_v34 = vmul.f32 %v4365_v16, %v724_v4  ;;  %v3216_v36 = vsel %vm2571_vm5, %v1406_v30, %v1443_v35 }
0x1561   :  { %v3217_v39 = vsel %vm2573_vm13, %v3216_v36, %v3166_v54 }
0x1562   :  { %v2518_v28 = vmul.f32 %v4367_v18, %v2500_v5  ;;  %v3218_v43 = vsel %vm2575_vm0, %v3217_v39, %v3215_v53  ;;  %v2572_v47 = vsel %vm2571_vm5, %v727_v34, %v765_v41 }
0x1563   :  { %v4369_v40 = vpop.eup %4368  ;;  %v3743_v45 = vrot.slane %v3218_v43, 7 }
0x1564   :  { %v2519_v1 = vsub.f32 0.0, %v2518_v28  ;;  %v2565_v19 = vmul.f32 %v4369_v40, %v5105_v58 }
0x1566   :  { %v2567_v33 = vsel %vm2566_vm7, %v5105_v58, %v2565_v19  ;;  %v2574_v8 = vsel %vm2573_vm13, %v2572_v47, %v2519_v1 }
0x1567   :  { %v2570_v9 = vsel %vm2568_vm8, %v2569_v44, %v2567_v33 }
0x1568   :  { %v2576_v27 = vsel %vm2575_vm0, %v2574_v8, %v2570_v9 }
0x1569   :  { %v3745_v10 = vsel %vm3572_vm4, %v2576_v27, %v3743_v45 }
0x156a   :  { %3747 = vrot.lane.b32.xlu0 %v3745_v10, %s4400_s3 }
0x15d4   :  { %v3738_v12 = vpop.xlane.xlu1 %3737 }
0x15d5   :  { %4370 = vlog2.f32 %v3738_v12 }
0x15dc   :  { %v3748_v57 = vpop.permute.xlu0 %3747 }
0x15e2   :  { %v4371_v32 = vpop.eup %4370 }
0x15e3   :  { %v3740_v6 = vmul.f32 0.6931472, %v4371_v32 }
0x15e5   :  { %v3741_v55 = vsub.f32 %v5084_v20, %v3740_v6 }
0x15e7   :  { %v3751_v58 = vsel %vm3750_vm9, %v3741_v55, %v3748_v57 }
0x15e8   :  { %v3753_v61 = vsel %vm3752_vm10, %v3751_v58, 0.0 }
0x15e9   :  { %3754 = vst [vmem:[%s5146_s4] sm:$0x3] %v3753_v61 }
0x15ea   :  { %3759 = vsyncpa [#allocation3], 1 }

</bundles_post_ra>
